<compile_context>
chip_gen: v7x
topology: tpu7x:2x2x1
jax: 0.10.0
libtpu: 0.0.40
codegen_flags: <defaults>
</compile_context>

<pallas_src>
import jax
import jax.numpy as jnp
from jax.experimental import pallas as pl
from jax.experimental.pallas import tpu as pltpu

# --- model dimensions (from the PyTorch module) -------------------------------
bottleneck = 2
DATA_SHAPE = (16, 16)                       # small synthetic spectra shape
n1 = DATA_SHAPE[0] * DATA_SHAPE[1]          # 256
n2, n3, n4, n5, n6, n7, n8, n9 = 128, 128, 64, 32, 32, 16, 8, 4

LAYER_DIMS = [
    (n1, n2), (n2, n3), (n3, n4), (n4, n5), (n5, n7), (n7, n8), (n8, n9),  # e1..e7
    (n9, bottleneck), (n9, bottleneck),                                    # e8_1, e8_2
    (bottleneck, n9), (n9, n8), (n8, n7), (n7, n6), (n6, n5), (n5, n4),    # d1..d6
    (n4, n3), (n3, n2), (n2, n1),                                          # d7..d9
]
NUM_LAYERS = len(LAYER_DIMS)                # 18 linear layers

N_MID = 15      # 128x128 slabs: e2..e7 (6) + fused mu/logvar head (1) + d1..d8 (8)
N_BROWS = 17    # bias rows: e1, e2..e7, head, d1..d8, d9
HEADW = 8       # narrow lane width for the eps input and the mu/logvar output


def _round_up(v, m):
    return ((v + m - 1) // m) * m


def _choose_tile(B, block_b):
    """Batch-tile rows: multiple of 8, bounded padding waste, and >=2 grid
    steps for large batches so the 'parallel' grid feeds both v7x TensorCores."""
    B8 = _round_up(max(B, 1), 8)
    tb = max(8, min(_round_up(block_b, 8), B8))
    steps = -(-B8 // tb)
    if B8 >= 256 and steps < 2:
        steps = 2
    tb = min(_round_up(-(-B8 // steps), 8), B8)
    return tb


# --- Pallas kernel: whole forward pass (matmuls + activations) ----------------
def vae_kernel(x_ref, eps_ref, w_e1_ref, w_mid_ref, w_d9_ref, b_ref,
               xh_ref, heads_ref, z_sc):
    f32, bf16 = jnp.float32, jnp.bfloat16

    def dense(h, wi, bi):
        # bf16 weights/activations on the MXU, f32 accumulate; bias add in f32.
        return (jnp.dot(h.astype(bf16), w_mid_ref[wi], preferred_element_type=f32)
                + b_ref[bi:bi + 1, :128])

    # --- encoder --------------------------------------------------------------
    x = x_ref[...]                                               # (TB, 256) bf16
    h = (jnp.dot(x, w_e1_ref[...], preferred_element_type=f32)   # e1: single K=256 dot
         + b_ref[0:1, :128])
    h = jnp.maximum(h, 0.0)
    for i in range(6):                                           # e2..e7
        h = jnp.maximum(dense(h, i, 1 + i), 0.0)

    # fused e8_1 / e8_2 head: mu in lanes 0-1, logvar in lanes 2-3
    heads = dense(h, 6, 7)                                       # (TB, 128)
    heads_ref[...] = heads[:, :HEADW]                            # narrow writeback

    # --- reparameterize: z = mu + eps * exp(0.5 * logvar) ----------------------
    mu2 = heads[:, 0:bottleneck]                                 # (TB, 2) f32
    lv2 = heads[:, bottleneck:2 * bottleneck]                    # (TB, 2) f32
    eps2 = eps_ref[...][:, 0:bottleneck]                         # (TB, 2) f32
    z2 = mu2 + eps2 * jnp.exp(0.5 * lv2)
    z_sc[...] = jnp.zeros_like(z_sc)                             # (TB, 128) scratch
    z_sc[:, 0:bottleneck] = z2                                   # z at lanes 0-1

    # --- decoder ----------------------------------------------------------------
    H = jnp.maximum(                                             # d1
        jnp.dot(z_sc[...].astype(bf16), w_mid_ref[7], preferred_element_type=f32)
        + b_ref[8:9, :128], 0.0)
    for i in range(1, 8):                                        # d2..d8
        H = jnp.maximum(dense(H, 7 + i, 8 + i), 0.0)
    logits = (jnp.dot(H.astype(bf16), w_d9_ref[...],             # d9: single N=256 dot
                      preferred_element_type=f32)
              + b_ref[16:17, :])
    # single-transcendental sigmoid; one unmasked lane-dense (TB, 256) store
    xh_ref[...] = 0.5 * (1.0 + jnp.tanh(0.5 * logits))


# --- parameter setup (deterministic, PyTorch-style uniform init) --------------
def init_params(key):
    params = []
    for (din, dout) in LAYER_DIMS:
        key, kw, kb = jax.random.split(key, 3)
        bound = 1.0 / (din ** 0.5)
        w = jax.random.uniform(kw, (dout, din), jnp.float32, -bound, bound)  # torch (out,in)
        b = jax.random.uniform(kb, (dout,), jnp.float32, -bound, bound)
        params.append((w, b))
    return params


def pack_params(params):
    """Pack the 18 torch-layout layers into: e1 (256,128) bf16, 15 mid 128x128
    bf16 slabs, d9 (128,256) bf16, and one (17,256) f32 bias stack."""
    f32 = jnp.float32
    w_e1 = params[0][0].T.astype(jnp.bfloat16)            # (256, 128)
    w_d9 = params[17][0].T.astype(jnp.bfloat16)           # (128, 256)
    w_mid = jnp.zeros((N_MID, 128, 128), f32)
    b = jnp.zeros((N_BROWS, n1), f32)

    b = b.at[0, :n2].set(params[0][1])                    # e1 bias
    for i in range(6):                                    # e2..e7 -> mid 0..5, rows 1..6
        wt, bv = params[1 + i]
        wt = wt.T                                         # (in, out)
        w_mid = w_mid.at[i, :wt.shape[0], :wt.shape[1]].set(wt)
        b = b.at[1 + i, :bv.shape[0]].set(bv)
    # fused e8_1 / e8_2 head -> mid 6, bias row 7 (mu lanes 0-1, logvar lanes 2-3)
    w_mid = w_mid.at[6, :n9, 0:bottleneck].set(params[7][0].T)
    w_mid = w_mid.at[6, :n9, bottleneck:2 * bottleneck].set(params[8][0].T)
    b = b.at[7, 0:bottleneck].set(params[7][1])
    b = b.at[7, bottleneck:2 * bottleneck].set(params[8][1])
    for i in range(8):                                    # d1..d8 -> mid 7..14, rows 8..15
        wt, bv = params[9 + i]
        wt = wt.T
        w_mid = w_mid.at[7 + i, :wt.shape[0], :wt.shape[1]].set(wt)
        b = b.at[8 + i, :bv.shape[0]].set(bv)
    b = b.at[16, :].set(params[17][1])                    # d9 bias (256-wide)

    return w_e1, w_mid.astype(jnp.bfloat16), w_d9, b


# --- wrapper -------------------------------------------------------------------
def vae_forward(x, eps, w_e1, w_mid, w_d9, b_all, *, block_b=512):
    """x: (B, H, W) float32, eps: (B, bottleneck) float32 -> (x_hat, mu, logvar)."""
    B = x.shape[0]
    x_flat = x.reshape(B, n1).astype(jnp.bfloat16)        # bf16 input DMA

    TB = _choose_tile(B, block_b)
    Bp = _round_up(B, TB)
    xp = jnp.zeros((Bp, n1), jnp.bfloat16).at[:B].set(x_flat)
    epsp = jnp.zeros((Bp, HEADW), jnp.float32).at[:B, 0:bottleneck].set(eps)

    grid = (Bp // TB,)
    x_spec = pl.BlockSpec((TB, n1), lambda i: (i, 0))
    eps_spec = pl.BlockSpec((TB, HEADW), lambda i: (i, 0))
    heads_spec = pl.BlockSpec((TB, HEADW), lambda i: (i, 0))
    # constant index_maps -> weights/biases stay VMEM-resident across grid steps
    we1_spec = pl.BlockSpec((n1, 128), lambda i: (0, 0))
    wmid_spec = pl.BlockSpec((N_MID, 128, 128), lambda i: (0, 0, 0))
    wd9_spec = pl.BlockSpec((128, n1), lambda i: (0, 0))
    b_spec = pl.BlockSpec((N_BROWS, n1), lambda i: (0, 0))

    xh, heads = pl.pallas_call(
        vae_kernel,
        out_shape=(jax.ShapeDtypeStruct((Bp, n1), jnp.float32),
                   jax.ShapeDtypeStruct((Bp, HEADW), jnp.float32)),
        grid=grid,
        in_specs=[x_spec, eps_spec, we1_spec, wmid_spec, wd9_spec, b_spec],
        out_specs=(x_spec, heads_spec),
        scratch_shapes=[pltpu.VMEM((TB, 128), jnp.float32)],
        compiler_params=pltpu.CompilerParams(
            dimension_semantics=("parallel",)),
    )(xp, epsp, w_e1, w_mid, w_d9, b_all)

    mu = heads[:B, 0:bottleneck]
    logvar = heads[:B, bottleneck:2 * bottleneck]
    return xh[:B], mu, logvar


# --- pure-JAX reference (mirrors the PyTorch forward + bf16 weight quant) ------
def vae_ref(x, eps, params):
    bf16, f32 = jnp.bfloat16, jnp.float32

    def dense(h, w, b):
        return (jnp.dot(h.astype(bf16), w.T.astype(bf16),
                        preferred_element_type=f32) + b)

    h = x.reshape(x.shape[0], n1).astype(f32)
    for i in range(7):
        h = jax.nn.relu(dense(h, *params[i]))
    mu = dense(h, *params[7])
    lv = dense(h, *params[8])
    z = mu + eps * jnp.exp(0.5 * lv)
    H = z
    for i in range(9, NUM_LAYERS):
        H = dense(H, *params[i])
        if i < NUM_LAYERS - 1:
            H = jax.nn.relu(H)
    return jax.nn.sigmoid(H), mu, lv


if __name__ == "__main__":
    key = jax.random.PRNGKey(0)
    kx, keps, kp = jax.random.split(key, 3)

    B = 8
    # dataset normalizes events to [0, 1]; mimic that range
    x = jax.random.uniform(kx, (B,) + DATA_SHAPE, jnp.float32, 0.0, 1.0)
    eps = jax.random.normal(keps, (B, bottleneck), jnp.float32)
    params = init_params(kp)
    w_e1, w_mid, w_d9, b_all = pack_params(params)

    x_hat, mu, logvar = vae_forward(x, eps, w_e1, w_mid, w_d9, b_all)
    jax.block_until_ready((x_hat, mu, logvar))

    x_hat_r, mu_r, lv_r = vae_ref(x, eps, params)
    assert x_hat.shape == (B, n1) and mu.shape == (B, bottleneck) and logvar.shape == (B, bottleneck)
    assert jnp.allclose(mu, mu_r, atol=2e-3, rtol=2e-3)
    assert jnp.allclose(logvar, lv_r, atol=2e-3, rtol=2e-3)
    assert jnp.allclose(x_hat, x_hat_r, atol=1e-2, rtol=1e-2)

    # exercise the multi-step batch grid (weights stay VMEM-resident across steps)
    B2 = 64
    k2x, k2e = jax.random.split(jax.random.PRNGKey(1))
    x2 = jax.random.uniform(k2x, (B2,) + DATA_SHAPE, jnp.float32, 0.0, 1.0)
    eps2 = jax.random.normal(k2e, (B2, bottleneck), jnp.float32)
    x_hat2, mu2, lv2 = vae_forward(x2, eps2, w_e1, w_mid, w_d9, b_all, block_b=32)
    jax.block_until_ready((x_hat2, mu2, lv2))
    x_hat2_r, mu2_r, lv2_r = vae_ref(x2, eps2, params)
    assert jnp.allclose(mu2, mu2_r, atol=2e-3, rtol=2e-3)
    assert jnp.allclose(lv2, lv2_r, atol=2e-3, rtol=2e-3)
    assert jnp.allclose(x_hat2, x_hat2_r, atol=1e-2, rtol=1e-2)

    print("KERNEL_OK")
</pallas_src>

<mosaic_0001>
module attributes {stable_mosaic.version = 11 : i64} {
  func.func @vae_kernel(%arg0: i32, %arg1: memref<8x256xbf16, #tpu.memory_space<vmem>>, %arg2: memref<8x8xf32, #tpu.memory_space<vmem>>, %arg3: memref<256x128xbf16, #tpu.memory_space<vmem>>, %arg4: memref<15x128x128xbf16, #tpu.memory_space<vmem>>, %arg5: memref<128x256xbf16, #tpu.memory_space<vmem>>, %arg6: memref<17x256xf32, #tpu.memory_space<vmem>>, %arg7: memref<8x256xf32, #tpu.memory_space<vmem>>, %arg8: memref<8x8xf32, #tpu.memory_space<vmem>>, %arg9: memref<8x128xf32, #tpu.memory_space<vmem>>) attributes {dimension_semantics = [#tpu.dimension_semantics<parallel>], iteration_bounds = array<i64: 1>, scalar_prefetch = 0 : i64, scratch_operands = 1 : i64, tpu.core_type = #tpu.core_type<tc>, window_params = [{transform_indices = @transform_0, window_bounds = array<i64: 8, 256>}, {transform_indices = @transform_1, window_bounds = array<i64: 8, 8>}, {pipeline_mode = #tpu.pipeline_mode<synchronous>, transform_indices = @transform_2, window_bounds = array<i64: 256, 128>}, {pipeline_mode = #tpu.pipeline_mode<synchronous>, transform_indices = @transform_3, window_bounds = array<i64: 15, 128, 128>}, {pipeline_mode = #tpu.pipeline_mode<synchronous>, transform_indices = @transform_4, window_bounds = array<i64: 128, 256>}, {pipeline_mode = #tpu.pipeline_mode<synchronous>, transform_indices = @transform_5, window_bounds = array<i64: 17, 256>}, {transform_indices = @transform_6, window_bounds = array<i64: 8, 256>}, {transform_indices = @transform_7, window_bounds = array<i64: 8, 8>}]} {
    %c0 = arith.constant 0 : index
    %c0_0 = arith.constant 0 : index
    %0 = vector.load %arg1[%c0, %c0_0] : memref<8x256xbf16, #tpu.memory_space<vmem>>, vector<8x256xbf16>
    %c0_1 = arith.constant 0 : index
    %c0_2 = arith.constant 0 : index
    %1 = vector.load %arg3[%c0_1, %c0_2] : memref<256x128xbf16, #tpu.memory_space<vmem>>, vector<256x128xbf16>
    %cst = arith.constant dense<0.000000e+00> : vector<8x128xf32>
    %2 = tpu.matmul %0, %1, %cst {dimension_numbers = #tpu.dot_dimension_numbers<[1], [0], [0], [1], [0, 0, 1, 1], [], []>} : vector<8x256xbf16>, vector<256x128xbf16>, vector<8x128xf32> -> vector<8x128xf32>
    %c0_3 = arith.constant 0 : index
    %c0_4 = arith.constant 0 : index
    %3 = vector.load %arg6[%c0_3, %c0_4] : memref<17x256xf32, #tpu.memory_space<vmem>>, vector<1x128xf32>
    %4 = vector.broadcast %3 : vector<1x128xf32> to vector<8x128xf32>
    %5 = arith.addf %2, %4 : vector<8x128xf32>
    %cst_5 = arith.constant 0.000000e+00 : f32
    %6 = vector.broadcast %cst_5 : f32 to vector<8x128xf32>
    %7 = arith.maximumf %5, %6 : vector<8x128xf32>
    %8 = arith.truncf %7 : vector<8x128xf32> to vector<8x128xbf16>
    %c0_6 = arith.constant 0 : index
    %c0_7 = arith.constant 0 : index
    %c0_8 = arith.constant 0 : index
    %9 = vector.load %arg4[%c0_6, %c0_7, %c0_8] : memref<15x128x128xbf16, #tpu.memory_space<vmem>>, vector<1x128x128xbf16>
    %10 = vector.shape_cast %9 : vector<1x128x128xbf16> to vector<128x128xbf16>
    %cst_9 = arith.constant dense<0.000000e+00> : vector<8x128xf32>
    %11 = tpu.matmul %8, %10, %cst_9 {dimension_numbers = #tpu.dot_dimension_numbers<[1], [0], [0], [1], [0, 0, 1, 1], [], []>} : vector<8x128xbf16>, vector<128x128xbf16>, vector<8x128xf32> -> vector<8x128xf32>
    %c1 = arith.constant 1 : index
    %c0_10 = arith.constant 0 : index
    %12 = vector.load %arg6[%c1, %c0_10] : memref<17x256xf32, #tpu.memory_space<vmem>>, vector<1x128xf32>
    %13 = vector.broadcast %12 : vector<1x128xf32> to vector<8x128xf32>
    %14 = arith.addf %11, %13 : vector<8x128xf32>
    %cst_11 = arith.constant 0.000000e+00 : f32
    %15 = vector.broadcast %cst_11 : f32 to vector<8x128xf32>
    %16 = arith.maximumf %14, %15 : vector<8x128xf32>
    %17 = arith.truncf %16 : vector<8x128xf32> to vector<8x128xbf16>
    %c1_12 = arith.constant 1 : index
    %c0_13 = arith.constant 0 : index
    %c0_14 = arith.constant 0 : index
    %18 = vector.load %arg4[%c1_12, %c0_13, %c0_14] : memref<15x128x128xbf16, #tpu.memory_space<vmem>>, vector<1x128x128xbf16>
    %19 = vector.shape_cast %18 : vector<1x128x128xbf16> to vector<128x128xbf16>
    %cst_15 = arith.constant dense<0.000000e+00> : vector<8x128xf32>
    %20 = tpu.matmul %17, %19, %cst_15 {dimension_numbers = #tpu.dot_dimension_numbers<[1], [0], [0], [1], [0, 0, 1, 1], [], []>} : vector<8x128xbf16>, vector<128x128xbf16>, vector<8x128xf32> -> vector<8x128xf32>
    %c2 = arith.constant 2 : index
    %c0_16 = arith.constant 0 : index
    %21 = vector.load %arg6[%c2, %c0_16] : memref<17x256xf32, #tpu.memory_space<vmem>>, vector<1x128xf32>
    %22 = vector.broadcast %21 : vector<1x128xf32> to vector<8x128xf32>
    %23 = arith.addf %20, %22 : vector<8x128xf32>
    %cst_17 = arith.constant 0.000000e+00 : f32
    %24 = vector.broadcast %cst_17 : f32 to vector<8x128xf32>
    %25 = arith.maximumf %23, %24 : vector<8x128xf32>
    %26 = arith.truncf %25 : vector<8x128xf32> to vector<8x128xbf16>
    %c2_18 = arith.constant 2 : index
    %c0_19 = arith.constant 0 : index
    %c0_20 = arith.constant 0 : index
    %27 = vector.load %arg4[%c2_18, %c0_19, %c0_20] : memref<15x128x128xbf16, #tpu.memory_space<vmem>>, vector<1x128x128xbf16>
    %28 = vector.shape_cast %27 : vector<1x128x128xbf16> to vector<128x128xbf16>
    %cst_21 = arith.constant dense<0.000000e+00> : vector<8x128xf32>
    %29 = tpu.matmul %26, %28, %cst_21 {dimension_numbers = #tpu.dot_dimension_numbers<[1], [0], [0], [1], [0, 0, 1, 1], [], []>} : vector<8x128xbf16>, vector<128x128xbf16>, vector<8x128xf32> -> vector<8x128xf32>
    %c3 = arith.constant 3 : index
    %c0_22 = arith.constant 0 : index
    %30 = vector.load %arg6[%c3, %c0_22] : memref<17x256xf32, #tpu.memory_space<vmem>>, vector<1x128xf32>
    %31 = vector.broadcast %30 : vector<1x128xf32> to vector<8x128xf32>
    %32 = arith.addf %29, %31 : vector<8x128xf32>
    %cst_23 = arith.constant 0.000000e+00 : f32
    %33 = vector.broadcast %cst_23 : f32 to vector<8x128xf32>
    %34 = arith.maximumf %32, %33 : vector<8x128xf32>
    %35 = arith.truncf %34 : vector<8x128xf32> to vector<8x128xbf16>
    %c3_24 = arith.constant 3 : index
    %c0_25 = arith.constant 0 : index
    %c0_26 = arith.constant 0 : index
    %36 = vector.load %arg4[%c3_24, %c0_25, %c0_26] : memref<15x128x128xbf16, #tpu.memory_space<vmem>>, vector<1x128x128xbf16>
    %37 = vector.shape_cast %36 : vector<1x128x128xbf16> to vector<128x128xbf16>
    %cst_27 = arith.constant dense<0.000000e+00> : vector<8x128xf32>
    %38 = tpu.matmul %35, %37, %cst_27 {dimension_numbers = #tpu.dot_dimension_numbers<[1], [0], [0], [1], [0, 0, 1, 1], [], []>} : vector<8x128xbf16>, vector<128x128xbf16>, vector<8x128xf32> -> vector<8x128xf32>
    %c4 = arith.constant 4 : index
    %c0_28 = arith.constant 0 : index
    %39 = vector.load %arg6[%c4, %c0_28] : memref<17x256xf32, #tpu.memory_space<vmem>>, vector<1x128xf32>
    %40 = vector.broadcast %39 : vector<1x128xf32> to vector<8x128xf32>
    %41 = arith.addf %38, %40 : vector<8x128xf32>
    %cst_29 = arith.constant 0.000000e+00 : f32
    %42 = vector.broadcast %cst_29 : f32 to vector<8x128xf32>
    %43 = arith.maximumf %41, %42 : vector<8x128xf32>
    %44 = arith.truncf %43 : vector<8x128xf32> to vector<8x128xbf16>
    %c4_30 = arith.constant 4 : index
    %c0_31 = arith.constant 0 : index
    %c0_32 = arith.constant 0 : index
    %45 = vector.load %arg4[%c4_30, %c0_31, %c0_32] : memref<15x128x128xbf16, #tpu.memory_space<vmem>>, vector<1x128x128xbf16>
    %46 = vector.shape_cast %45 : vector<1x128x128xbf16> to vector<128x128xbf16>
    %cst_33 = arith.constant dense<0.000000e+00> : vector<8x128xf32>
    %47 = tpu.matmul %44, %46, %cst_33 {dimension_numbers = #tpu.dot_dimension_numbers<[1], [0], [0], [1], [0, 0, 1, 1], [], []>} : vector<8x128xbf16>, vector<128x128xbf16>, vector<8x128xf32> -> vector<8x128xf32>
    %c5 = arith.constant 5 : index
    %c0_34 = arith.constant 0 : index
    %48 = vector.load %arg6[%c5, %c0_34] : memref<17x256xf32, #tpu.memory_space<vmem>>, vector<1x128xf32>
    %49 = vector.broadcast %48 : vector<1x128xf32> to vector<8x128xf32>
    %50 = arith.addf %47, %49 : vector<8x128xf32>
    %cst_35 = arith.constant 0.000000e+00 : f32
    %51 = vector.broadcast %cst_35 : f32 to vector<8x128xf32>
    %52 = arith.maximumf %50, %51 : vector<8x128xf32>
    %53 = arith.truncf %52 : vector<8x128xf32> to vector<8x128xbf16>
    %c5_36 = arith.constant 5 : index
    %c0_37 = arith.constant 0 : index
    %c0_38 = arith.constant 0 : index
    %54 = vector.load %arg4[%c5_36, %c0_37, %c0_38] : memref<15x128x128xbf16, #tpu.memory_space<vmem>>, vector<1x128x128xbf16>
    %55 = vector.shape_cast %54 : vector<1x128x128xbf16> to vector<128x128xbf16>
    %cst_39 = arith.constant dense<0.000000e+00> : vector<8x128xf32>
    %56 = tpu.matmul %53, %55, %cst_39 {dimension_numbers = #tpu.dot_dimension_numbers<[1], [0], [0], [1], [0, 0, 1, 1], [], []>} : vector<8x128xbf16>, vector<128x128xbf16>, vector<8x128xf32> -> vector<8x128xf32>
    %c6 = arith.constant 6 : index
    %c0_40 = arith.constant 0 : index
    %57 = vector.load %arg6[%c6, %c0_40] : memref<17x256xf32, #tpu.memory_space<vmem>>, vector<1x128xf32>
    %58 = vector.broadcast %57 : vector<1x128xf32> to vector<8x128xf32>
    %59 = arith.addf %56, %58 : vector<8x128xf32>
    %cst_41 = arith.constant 0.000000e+00 : f32
    %60 = vector.broadcast %cst_41 : f32 to vector<8x128xf32>
    %61 = arith.maximumf %59, %60 : vector<8x128xf32>
    %62 = arith.truncf %61 : vector<8x128xf32> to vector<8x128xbf16>
    %c6_42 = arith.constant 6 : index
    %c0_43 = arith.constant 0 : index
    %c0_44 = arith.constant 0 : index
    %63 = vector.load %arg4[%c6_42, %c0_43, %c0_44] : memref<15x128x128xbf16, #tpu.memory_space<vmem>>, vector<1x128x128xbf16>
    %64 = vector.shape_cast %63 : vector<1x128x128xbf16> to vector<128x128xbf16>
    %cst_45 = arith.constant dense<0.000000e+00> : vector<8x128xf32>
    %65 = tpu.matmul %62, %64, %cst_45 {dimension_numbers = #tpu.dot_dimension_numbers<[1], [0], [0], [1], [0, 0, 1, 1], [], []>} : vector<8x128xbf16>, vector<128x128xbf16>, vector<8x128xf32> -> vector<8x128xf32>
    %c7 = arith.constant 7 : index
    %c0_46 = arith.constant 0 : index
    %66 = vector.load %arg6[%c7, %c0_46] : memref<17x256xf32, #tpu.memory_space<vmem>>, vector<1x128xf32>
    %67 = vector.broadcast %66 : vector<1x128xf32> to vector<8x128xf32>
    %68 = arith.addf %65, %67 : vector<8x128xf32>
    %69 = vector.extract_strided_slice %68 {offsets = [0, 0], sizes = [8, 8], strides = [1, 1]} : vector<8x128xf32> to vector<8x8xf32>
    %c0_47 = arith.constant 0 : index
    %c0_48 = arith.constant 0 : index
    %70 = vector.load %arg8[%c0_47, %c0_48] : memref<8x8xf32, #tpu.memory_space<vmem>>, vector<8x8xf32>
    tpu.vector_store %arg8[%c0_47, %c0_48], %69 {strides = array<i32>} : memref<8x8xf32, #tpu.memory_space<vmem>>, vector<8x8xf32>,
    %71 = vector.extract_strided_slice %68 {offsets = [0, 0], sizes = [8, 2], strides = [1, 1]} : vector<8x128xf32> to vector<8x2xf32>
    %72 = vector.extract_strided_slice %68 {offsets = [0, 2], sizes = [8, 2], strides = [1, 1]} : vector<8x128xf32> to vector<8x2xf32>
    %c0_49 = arith.constant 0 : index
    %c0_50 = arith.constant 0 : index
    %73 = vector.load %arg2[%c0_49, %c0_50] : memref<8x8xf32, #tpu.memory_space<vmem>>, vector<8x8xf32>
    %74 = vector.extract_strided_slice %73 {offsets = [0, 0], sizes = [8, 2], strides = [1, 1]} : vector<8x8xf32> to vector<8x2xf32>
    %cst_51 = arith.constant 5.000000e-01 : f32
    %75 = vector.broadcast %cst_51 : f32 to vector<8x2xf32>
    %76 = arith.mulf %75, %72 : vector<8x2xf32>
    %77 = math.exp %76 : vector<8x2xf32>
    %78 = arith.mulf %74, %77 : vector<8x2xf32>
    %79 = arith.addf %71, %78 : vector<8x2xf32>
    %cst_52 = arith.constant 0.000000e+00 : f32
    %80 = vector.broadcast %cst_52 : f32 to vector<8x128xf32>
    %c0_53 = arith.constant 0 : index
    %c0_54 = arith.constant 0 : index
    %81 = vector.load %arg9[%c0_53, %c0_54] : memref<8x128xf32, #tpu.memory_space<vmem>>, vector<8x128xf32>
    tpu.vector_store %arg9[%c0_53, %c0_54], %80 {strides = array<i32>} : memref<8x128xf32, #tpu.memory_space<vmem>>, vector<8x128xf32>,
    %c0_55 = arith.constant 0 : index
    %c0_56 = arith.constant 0 : index
    %82 = vector.load %arg9[%c0_55, %c0_56] : memref<8x128xf32, #tpu.memory_space<vmem>>, vector<8x2xf32>
    tpu.vector_store %arg9[%c0_55, %c0_56], %79 {strides = array<i32>} : memref<8x128xf32, #tpu.memory_space<vmem>>, vector<8x2xf32>,
    %c0_57 = arith.constant 0 : index
    %c0_58 = arith.constant 0 : index
    %83 = vector.load %arg9[%c0_57, %c0_58] : memref<8x128xf32, #tpu.memory_space<vmem>>, vector<8x128xf32>
    %84 = arith.truncf %83 : vector<8x128xf32> to vector<8x128xbf16>
    %c7_59 = arith.constant 7 : index
    %c0_60 = arith.constant 0 : index
    %c0_61 = arith.constant 0 : index
    %85 = vector.load %arg4[%c7_59, %c0_60, %c0_61] : memref<15x128x128xbf16, #tpu.memory_space<vmem>>, vector<1x128x128xbf16>
    %86 = vector.shape_cast %85 : vector<1x128x128xbf16> to vector<128x128xbf16>
    %cst_62 = arith.constant dense<0.000000e+00> : vector<8x128xf32>
    %87 = tpu.matmul %84, %86, %cst_62 {dimension_numbers = #tpu.dot_dimension_numbers<[1], [0], [0], [1], [0, 0, 1, 1], [], []>} : vector<8x128xbf16>, vector<128x128xbf16>, vector<8x128xf32> -> vector<8x128xf32>
    %c8 = arith.constant 8 : index
    %c0_63 = arith.constant 0 : index
    %88 = vector.load %arg6[%c8, %c0_63] : memref<17x256xf32, #tpu.memory_space<vmem>>, vector<1x128xf32>
    %89 = vector.broadcast %88 : vector<1x128xf32> to vector<8x128xf32>
    %90 = arith.addf %87, %89 : vector<8x128xf32>
    %cst_64 = arith.constant 0.000000e+00 : f32
    %91 = vector.broadcast %cst_64 : f32 to vector<8x128xf32>
    %92 = arith.maximumf %90, %91 : vector<8x128xf32>
    %93 = arith.truncf %92 : vector<8x128xf32> to vector<8x128xbf16>
    %c8_65 = arith.constant 8 : index
    %c0_66 = arith.constant 0 : index
    %c0_67 = arith.constant 0 : index
    %94 = vector.load %arg4[%c8_65, %c0_66, %c0_67] : memref<15x128x128xbf16, #tpu.memory_space<vmem>>, vector<1x128x128xbf16>
    %95 = vector.shape_cast %94 : vector<1x128x128xbf16> to vector<128x128xbf16>
    %cst_68 = arith.constant dense<0.000000e+00> : vector<8x128xf32>
    %96 = tpu.matmul %93, %95, %cst_68 {dimension_numbers = #tpu.dot_dimension_numbers<[1], [0], [0], [1], [0, 0, 1, 1], [], []>} : vector<8x128xbf16>, vector<128x128xbf16>, vector<8x128xf32> -> vector<8x128xf32>
    %c9 = arith.constant 9 : index
    %c0_69 = arith.constant 0 : index
    %97 = vector.load %arg6[%c9, %c0_69] : memref<17x256xf32, #tpu.memory_space<vmem>>, vector<1x128xf32>
    %98 = vector.broadcast %97 : vector<1x128xf32> to vector<8x128xf32>
    %99 = arith.addf %96, %98 : vector<8x128xf32>
    %cst_70 = arith.constant 0.000000e+00 : f32
    %100 = vector.broadcast %cst_70 : f32 to vector<8x128xf32>
    %101 = arith.maximumf %99, %100 : vector<8x128xf32>
    %102 = arith.truncf %101 : vector<8x128xf32> to vector<8x128xbf16>
    %c9_71 = arith.constant 9 : index
    %c0_72 = arith.constant 0 : index
    %c0_73 = arith.constant 0 : index
    %103 = vector.load %arg4[%c9_71, %c0_72, %c0_73] : memref<15x128x128xbf16, #tpu.memory_space<vmem>>, vector<1x128x128xbf16>
    %104 = vector.shape_cast %103 : vector<1x128x128xbf16> to vector<128x128xbf16>
    %cst_74 = arith.constant dense<0.000000e+00> : vector<8x128xf32>
    %105 = tpu.matmul %102, %104, %cst_74 {dimension_numbers = #tpu.dot_dimension_numbers<[1], [0], [0], [1], [0, 0, 1, 1], [], []>} : vector<8x128xbf16>, vector<128x128xbf16>, vector<8x128xf32> -> vector<8x128xf32>
    %c10 = arith.constant 10 : index
    %c0_75 = arith.constant 0 : index
    %106 = vector.load %arg6[%c10, %c0_75] : memref<17x256xf32, #tpu.memory_space<vmem>>, vector<1x128xf32>
    %107 = vector.broadcast %106 : vector<1x128xf32> to vector<8x128xf32>
    %108 = arith.addf %105, %107 : vector<8x128xf32>
    %cst_76 = arith.constant 0.000000e+00 : f32
    %109 = vector.broadcast %cst_76 : f32 to vector<8x128xf32>
    %110 = arith.maximumf %108, %109 : vector<8x128xf32>
    %111 = arith.truncf %110 : vector<8x128xf32> to vector<8x128xbf16>
    %c10_77 = arith.constant 10 : index
    %c0_78 = arith.constant 0 : index
    %c0_79 = arith.constant 0 : index
    %112 = vector.load %arg4[%c10_77, %c0_78, %c0_79] : memref<15x128x128xbf16, #tpu.memory_space<vmem>>, vector<1x128x128xbf16>
    %113 = vector.shape_cast %112 : vector<1x128x128xbf16> to vector<128x128xbf16>
    %cst_80 = arith.constant dense<0.000000e+00> : vector<8x128xf32>
    %114 = tpu.matmul %111, %113, %cst_80 {dimension_numbers = #tpu.dot_dimension_numbers<[1], [0], [0], [1], [0, 0, 1, 1], [], []>} : vector<8x128xbf16>, vector<128x128xbf16>, vector<8x128xf32> -> vector<8x128xf32>
    %c11 = arith.constant 11 : index
    %c0_81 = arith.constant 0 : index
    %115 = vector.load %arg6[%c11, %c0_81] : memref<17x256xf32, #tpu.memory_space<vmem>>, vector<1x128xf32>
    %116 = vector.broadcast %115 : vector<1x128xf32> to vector<8x128xf32>
    %117 = arith.addf %114, %116 : vector<8x128xf32>
    %cst_82 = arith.constant 0.000000e+00 : f32
    %118 = vector.broadcast %cst_82 : f32 to vector<8x128xf32>
    %119 = arith.maximumf %117, %118 : vector<8x128xf32>
    %120 = arith.truncf %119 : vector<8x128xf32> to vector<8x128xbf16>
    %c11_83 = arith.constant 11 : index
    %c0_84 = arith.constant 0 : index
    %c0_85 = arith.constant 0 : index
    %121 = vector.load %arg4[%c11_83, %c0_84, %c0_85] : memref<15x128x128xbf16, #tpu.memory_space<vmem>>, vector<1x128x128xbf16>
    %122 = vector.shape_cast %121 : vector<1x128x128xbf16> to vector<128x128xbf16>
    %cst_86 = arith.constant dense<0.000000e+00> : vector<8x128xf32>
    %123 = tpu.matmul %120, %122, %cst_86 {dimension_numbers = #tpu.dot_dimension_numbers<[1], [0], [0], [1], [0, 0, 1, 1], [], []>} : vector<8x128xbf16>, vector<128x128xbf16>, vector<8x128xf32> -> vector<8x128xf32>
    %c12 = arith.constant 12 : index
    %c0_87 = arith.constant 0 : index
    %124 = vector.load %arg6[%c12, %c0_87] : memref<17x256xf32, #tpu.memory_space<vmem>>, vector<1x128xf32>
    %125 = vector.broadcast %124 : vector<1x128xf32> to vector<8x128xf32>
    %126 = arith.addf %123, %125 : vector<8x128xf32>
    %cst_88 = arith.constant 0.000000e+00 : f32
    %127 = vector.broadcast %cst_88 : f32 to vector<8x128xf32>
    %128 = arith.maximumf %126, %127 : vector<8x128xf32>
    %129 = arith.truncf %128 : vector<8x128xf32> to vector<8x128xbf16>
    %c12_89 = arith.constant 12 : index
    %c0_90 = arith.constant 0 : index
    %c0_91 = arith.constant 0 : index
    %130 = vector.load %arg4[%c12_89, %c0_90, %c0_91] : memref<15x128x128xbf16, #tpu.memory_space<vmem>>, vector<1x128x128xbf16>
    %131 = vector.shape_cast %130 : vector<1x128x128xbf16> to vector<128x128xbf16>
    %cst_92 = arith.constant dense<0.000000e+00> : vector<8x128xf32>
    %132 = tpu.matmul %129, %131, %cst_92 {dimension_numbers = #tpu.dot_dimension_numbers<[1], [0], [0], [1], [0, 0, 1, 1], [], []>} : vector<8x128xbf16>, vector<128x128xbf16>, vector<8x128xf32> -> vector<8x128xf32>
    %c13 = arith.constant 13 : index
    %c0_93 = arith.constant 0 : index
    %133 = vector.load %arg6[%c13, %c0_93] : memref<17x256xf32, #tpu.memory_space<vmem>>, vector<1x128xf32>
    %134 = vector.broadcast %133 : vector<1x128xf32> to vector<8x128xf32>
    %135 = arith.addf %132, %134 : vector<8x128xf32>
    %cst_94 = arith.constant 0.000000e+00 : f32
    %136 = vector.broadcast %cst_94 : f32 to vector<8x128xf32>
    %137 = arith.maximumf %135, %136 : vector<8x128xf32>
    %138 = arith.truncf %137 : vector<8x128xf32> to vector<8x128xbf16>
    %c13_95 = arith.constant 13 : index
    %c0_96 = arith.constant 0 : index
    %c0_97 = arith.constant 0 : index
    %139 = vector.load %arg4[%c13_95, %c0_96, %c0_97] : memref<15x128x128xbf16, #tpu.memory_space<vmem>>, vector<1x128x128xbf16>
    %140 = vector.shape_cast %139 : vector<1x128x128xbf16> to vector<128x128xbf16>
    %cst_98 = arith.constant dense<0.000000e+00> : vector<8x128xf32>
    %141 = tpu.matmul %138, %140, %cst_98 {dimension_numbers = #tpu.dot_dimension_numbers<[1], [0], [0], [1], [0, 0, 1, 1], [], []>} : vector<8x128xbf16>, vector<128x128xbf16>, vector<8x128xf32> -> vector<8x128xf32>
    %c14 = arith.constant 14 : index
    %c0_99 = arith.constant 0 : index
    %142 = vector.load %arg6[%c14, %c0_99] : memref<17x256xf32, #tpu.memory_space<vmem>>, vector<1x128xf32>
    %143 = vector.broadcast %142 : vector<1x128xf32> to vector<8x128xf32>
    %144 = arith.addf %141, %143 : vector<8x128xf32>
    %cst_100 = arith.constant 0.000000e+00 : f32
    %145 = vector.broadcast %cst_100 : f32 to vector<8x128xf32>
    %146 = arith.maximumf %144, %145 : vector<8x128xf32>
    %147 = arith.truncf %146 : vector<8x128xf32> to vector<8x128xbf16>
    %c14_101 = arith.constant 14 : index
    %c0_102 = arith.constant 0 : index
    %c0_103 = arith.constant 0 : index
    %148 = vector.load %arg4[%c14_101, %c0_102, %c0_103] : memref<15x128x128xbf16, #tpu.memory_space<vmem>>, vector<1x128x128xbf16>
    %149 = vector.shape_cast %148 : vector<1x128x128xbf16> to vector<128x128xbf16>
    %cst_104 = arith.constant dense<0.000000e+00> : vector<8x128xf32>
    %150 = tpu.matmul %147, %149, %cst_104 {dimension_numbers = #tpu.dot_dimension_numbers<[1], [0], [0], [1], [0, 0, 1, 1], [], []>} : vector<8x128xbf16>, vector<128x128xbf16>, vector<8x128xf32> -> vector<8x128xf32>
    %c15 = arith.constant 15 : index
    %c0_105 = arith.constant 0 : index
    %151 = vector.load %arg6[%c15, %c0_105] : memref<17x256xf32, #tpu.memory_space<vmem>>, vector<1x128xf32>
    %152 = vector.broadcast %151 : vector<1x128xf32> to vector<8x128xf32>
    %153 = arith.addf %150, %152 : vector<8x128xf32>
    %cst_106 = arith.constant 0.000000e+00 : f32
    %154 = vector.broadcast %cst_106 : f32 to vector<8x128xf32>
    %155 = arith.maximumf %153, %154 : vector<8x128xf32>
    %156 = arith.truncf %155 : vector<8x128xf32> to vector<8x128xbf16>
    %c0_107 = arith.constant 0 : index
    %c0_108 = arith.constant 0 : index
    %157 = vector.load %arg5[%c0_107, %c0_108] : memref<128x256xbf16, #tpu.memory_space<vmem>>, vector<128x256xbf16>
    %cst_109 = arith.constant dense<0.000000e+00> : vector<8x256xf32>
    %158 = tpu.matmul %156, %157, %cst_109 {dimension_numbers = #tpu.dot_dimension_numbers<[1], [0], [0], [1], [0, 0, 1, 1], [], []>} : vector<8x128xbf16>, vector<128x256xbf16>, vector<8x256xf32> -> vector<8x256xf32>
    %c16 = arith.constant 16 : index
    %c0_110 = arith.constant 0 : index
    %159 = vector.load %arg6[%c16, %c0_110] : memref<17x256xf32, #tpu.memory_space<vmem>>, vector<1x256xf32>
    %160 = vector.broadcast %159 : vector<1x256xf32> to vector<8x256xf32>
    %161 = arith.addf %158, %160 : vector<8x256xf32>
    %cst_111 = arith.constant 5.000000e-01 : f32
    %162 = vector.broadcast %cst_111 : f32 to vector<8x256xf32>
    %163 = arith.mulf %162, %161 : vector<8x256xf32>
    %164 = math.tanh %163 : vector<8x256xf32>
    %cst_112 = arith.constant 1.000000e+00 : f32
    %165 = vector.broadcast %cst_112 : f32 to vector<8x256xf32>
    %166 = arith.addf %165, %164 : vector<8x256xf32>
    %cst_113 = arith.constant 5.000000e-01 : f32
    %167 = vector.broadcast %cst_113 : f32 to vector<8x256xf32>
    %168 = arith.mulf %167, %166 : vector<8x256xf32>
    %c0_114 = arith.constant 0 : index
    %c0_115 = arith.constant 0 : index
    %169 = vector.load %arg7[%c0_114, %c0_115] : memref<8x256xf32, #tpu.memory_space<vmem>>, vector<8x256xf32>
    tpu.vector_store %arg7[%c0_114, %c0_115], %168 {strides = array<i32>} : memref<8x256xf32, #tpu.memory_space<vmem>>, vector<8x256xf32>,
    return
  }
  func.func @transform_0(%arg0: i32) -> (i32, i32) {
    %c0_i32 = arith.constant 0 : i32
    %c0_i32_0 = arith.constant 0 : i32
    return %arg0, %c0_i32 : i32, i32
  }
  func.func @transform_1(%arg0: i32) -> (i32, i32) {
    %c0_i32 = arith.constant 0 : i32
    %c0_i32_0 = arith.constant 0 : i32
    return %arg0, %c0_i32 : i32, i32
  }
  func.func @transform_2(%arg0: i32) -> (i32, i32) {
    %c0_i32 = arith.constant 0 : i32
    %c0_i32_0 = arith.constant 0 : i32
    %c0_i32_1 = arith.constant 0 : i32
    return %c0_i32, %c0_i32_0 : i32, i32
  }
  func.func @transform_3(%arg0: i32) -> (i32, i32, i32) {
    %c0_i32 = arith.constant 0 : i32
    %c0_i32_0 = arith.constant 0 : i32
    %c0_i32_1 = arith.constant 0 : i32
    %c0_i32_2 = arith.constant 0 : i32
    return %c0_i32, %c0_i32_0, %c0_i32_1 : i32, i32, i32
  }
  func.func @transform_4(%arg0: i32) -> (i32, i32) {
    %c0_i32 = arith.constant 0 : i32
    %c0_i32_0 = arith.constant 0 : i32
    %c0_i32_1 = arith.constant 0 : i32
    return %c0_i32, %c0_i32_0 : i32, i32
  }
  func.func @transform_5(%arg0: i32) -> (i32, i32) {
    %c0_i32 = arith.constant 0 : i32
    %c0_i32_0 = arith.constant 0 : i32
    %c0_i32_1 = arith.constant 0 : i32
    return %c0_i32, %c0_i32_0 : i32, i32
  }
  func.func @transform_6(%arg0: i32) -> (i32, i32) {
    %c0_i32 = arith.constant 0 : i32
    %c0_i32_0 = arith.constant 0 : i32
    return %arg0, %c0_i32 : i32, i32
  }
  func.func @transform_7(%arg0: i32) -> (i32, i32) {
    %c0_i32 = arith.constant 0 : i32
    %c0_i32_0 = arith.constant 0 : i32
    return %arg0, %c0_i32 : i32, i32
  }
}

</mosaic_0001>

<bundles_post_ra>
// kernel: tpu_custom_call.1
= control target key start
LH: loop header
LB: loop body
LE: loop exit
PB: predicated region body
PF: predicated region fallthrough
CT: control target
= control target key end

     0   :  { %13 = vsyncpa [#allocation4], 0  ;;  %s3410_s0 = inlined_call_operand.hbm [shape: bf16[8,256], index: 0, kind: input, shape index: {}]   ;;  %s3411_s1 = inlined_call_operand.hbm [shape: f32[8,8], index: 1, kind: input, shape index: {}]   ;;  %s3412_s2 = inlined_call_operand.hbm [shape: bf16[256,128], index: 2, kind: input, shape index: {}]   ;;  %s3413_s3 = inlined_call_operand.hbm [shape: bf16[15,128,128], index: 3, kind: input, shape index: {}]   ;;  %s3414_s4 = inlined_call_operand.hbm [shape: bf16[128,256], index: 4, kind: input, shape index: {}]   ;;  %s3415_s5 = inlined_call_operand.hbm [shape: f32[17,256], index: 5, kind: input, shape index: {}]   ;;  %s3416_s6 = inlined_call_operand.hbm [shape: f32[8,256], index: 6, kind: output, shape index: {0}]   ;;  %s3417_s7 = inlined_call_operand.hbm [shape: f32[8,8], index: 7, kind: output, shape index: {1}]  }
   0x1   :  { %14 = vsyncpa [#allocation7], 0 }
   0x2   :  { %15 = vsyncpa [#allocation10], 0 }
   0x3   :  { %16 = vsyncpa [#allocation13], 0 }
   0x4   :  { %17 = vsyncpa [#allocation5], 0 }
   0x5   :  { %18 = vsyncpa [#allocation16], 0  ;;  %s3097_s24 = smov [#allocation6]   ;;  %s2909_s28 = scalar_lea.hbm %s3411_s1, 128 }
   0x6   :  { %s35_s25 = sshll.u32 %s3097_s24, 4  ;;  %p2910_p0 = scmp.ne.s32.totalorder %s3411_s1, %s2909_s28  ;;  %s36_s25 = int_to_ptr.vmem [resolvable:$true] %s35_s25 }
   0x7   :  { %p2913_p1 = scmp.lt.u32.totalorder %s2909_s28, %s3411_s1 }
   0x9   :  { %p2915_p2 = pnand %p2913_p1, %p2910_p0 }
   0xb   :  { %2918 = shalt.err (!%p2915_p2)
}
   0xc   :  { %s2919_s10 = scalar_lea.vmem %s36_s25, 128  ;;  %p2924_p4 = scmp.lt.s32.totalorder %s36_s25, %s36_s25 }
   0xd   :  { %p2920_p3 = scmp.ne.s32.totalorder %s36_s25, %s2919_s10  ;;  %p2925_p5 = scmp.lt.s32.totalorder %s2919_s10, %s2919_s10 }
   0xf   :  { %p2926_p6 = por %p2925_p5, %p2924_p4 }
  0x11   :  { %p2927_p7 = pnand %p2926_p6, %p2920_p3 }
  0x13   :  { %2930 = shalt.err (!%p2927_p7)
}
  0x14   :  { %38 = dma.hbm_to_vmem [thread:$0]  %s3411_s1, 128, %s36_s25, [#allocation7]  }
  0x15   :  { %s3098_s13 = smov [#allocation9]   ;;  %s3099_s15 = smov [#allocation3]  }
  0x16   :  { %s56_s14 = sshll.u32 %s3098_s13, 4  ;;  %s25_s16 = sshll.u32 %s3099_s15, 4  ;;  %s57_s14 = int_to_ptr.vmem [resolvable:$true] %s56_s14  ;;  %s26_s16 = int_to_ptr.vmem [resolvable:$true] %s25_s16 }
  0x17   :  { %s2931_s19 = scalar_lea.hbm %s3413_s3, 15360 }
  0x18   :  { %p2932_p8 = scmp.ne.s32.totalorder %s3413_s3, %s2931_s19  ;;  %p2935_p9 = scmp.lt.u32.totalorder %s2931_s19, %s3413_s3 }
  0x1a   :  { %p2937_p10 = pnand %p2935_p9, %p2932_p8 }
  0x1c   :  { %2940 = shalt.err (!%p2937_p10)
}
  0x1d   :  { %s2941_s1 = scalar_lea.vmem %s57_s14, 15360  ;;  %p2946_p12 = scmp.lt.s32.totalorder %s57_s14, %s57_s14 }
  0x1e   :  { %p2942_p11 = scmp.ne.s32.totalorder %s57_s14, %s2941_s1  ;;  %p2947_p13 = scmp.lt.s32.totalorder %s2941_s1, %s2941_s1 }
  0x20   :  { %p2948_p0 = por %p2947_p13, %p2946_p12 }
  0x22   :  { %p2949_p1 = pnand %p2948_p0, %p2942_p11 }
  0x24   :  { %2952 = shalt.err (!%p2949_p1)
}
  0x25   :  { %s3100_s24 = smov 64   ;;  %s3101_s25 = smov 4  }
  0x26   :  { %62 = dma.hbm_to_vmem [thread:$0]  %s3413_s3, 15360, %s57_s14, [#allocation10], %s3100_s24, %s3100_s24, %s3101_s25  }
  0x27   :  { %s2953_s30 = scalar_lea.hbm %s3410_s0, 128 }
  0x28   :  { %p2954_p2 = scmp.ne.s32.totalorder %s3410_s0, %s2953_s30  ;;  %p2957_p3 = scmp.lt.u32.totalorder %s2953_s30, %s3410_s0 }
  0x2a   :  { %p2959_p4 = pnand %p2957_p3, %p2954_p2 }
  0x2c   :  { %2962 = shalt.err (!%p2959_p4)
}
  0x2d   :  { %s2963_s12 = scalar_lea.vmem %s26_s16, 128  ;;  %p2968_p6 = scmp.lt.s32.totalorder %s26_s16, %s26_s16 }
  0x2e   :  { %p2964_p5 = scmp.ne.s32.totalorder %s26_s16, %s2963_s12  ;;  %p2969_p7 = scmp.lt.s32.totalorder %s2963_s12, %s2963_s12 }
  0x30   :  { %p2970_p8 = por %p2969_p7, %p2968_p6 }
  0x32   :  { %p2971_p9 = pnand %p2970_p8, %p2964_p5 }
  0x34   :  { %2974 = shalt.err (!%p2971_p9)
}
  0x35   :  { %28 = dma.hbm_to_vmem [thread:$0]  %s3410_s0, 128, %s26_s16, [#allocation4]  }
  0x36   :  { %s3102_s14 = smov [#allocation8]   ;;  %s3103_s17 = smov [#allocation11]  }
  0x37   :  { %s44_s15 = sshll.u32 %s3102_s14, 4  ;;  %s68_s18 = sshll.u32 %s3103_s17, 4  ;;  %s45_s15 = int_to_ptr.vmem [resolvable:$true] %s44_s15  ;;  %s69_s18 = int_to_ptr.vmem [resolvable:$true] %s68_s18 }
  0x38   :  { %s2975_s21 = scalar_lea.hbm %s3412_s2, 2048 }
  0x39   :  { %p2976_p10 = scmp.ne.s32.totalorder %s3412_s2, %s2975_s21  ;;  %p2979_p11 = scmp.lt.u32.totalorder %s2975_s21, %s3412_s2 }
  0x3b   :  { %p2981_p12 = pnand %p2979_p11, %p2976_p10 }
  0x3d   :  { %2984 = shalt.err (!%p2981_p12)
}
  0x3e   :  { %s2985_s0 = scalar_lea.vmem %s45_s15, 2048  ;;  %p2990_p0 = scmp.lt.s32.totalorder %s45_s15, %s45_s15 }
  0x3f   :  { %p2986_p13 = scmp.ne.s32.totalorder %s45_s15, %s2985_s0  ;;  %p2991_p1 = scmp.lt.s32.totalorder %s2985_s0, %s2985_s0 }
  0x41   :  { %p2992_p2 = por %p2991_p1, %p2990_p0 }
  0x43   :  { %p2993_p3 = pnand %p2992_p2, %p2986_p13 }
  0x45   :  { %2996 = shalt.err (!%p2993_p3)
}
  0x46   :  { %50 = dma.hbm_to_vmem [thread:$0]  %s3412_s2, 2048, %s45_s15, [#allocation7], %s3100_s24, %s3100_s24, %s3101_s25  }
  0x47   :  { %s2997_s30 = scalar_lea.hbm %s3414_s4, 2048 }
  0x48   :  { %p2998_p4 = scmp.ne.s32.totalorder %s3414_s4, %s2997_s30  ;;  %p3001_p5 = scmp.lt.u32.totalorder %s2997_s30, %s3414_s4 }
  0x4a   :  { %p3003_p6 = pnand %p3001_p5, %p2998_p4 }
  0x4c   :  { %3006 = shalt.err (!%p3003_p6)
}
  0x4d   :  { %s3007_s12 = scalar_lea.vmem %s69_s18, 2048  ;;  %p3012_p8 = scmp.lt.s32.totalorder %s69_s18, %s69_s18 }
  0x4e   :  { %p3008_p7 = scmp.ne.s32.totalorder %s69_s18, %s3007_s12  ;;  %p3013_p9 = scmp.lt.s32.totalorder %s3007_s12, %s3007_s12 }
  0x50   :  { %p3014_p10 = por %p3013_p9, %p3012_p8 }
  0x52   :  { %p3015_p11 = pnand %p3014_p10, %p3008_p7 }
  0x54   :  { %3018 = shalt.err (!%p3015_p11)
}
  0x55   :  { %s3104_s2 = smov 128   ;;  %s3105_s24 = smov 8  }
  0x56   :  { %74 = dma.hbm_to_vmem [thread:$0]  %s3414_s4, 2048, %s69_s18, [#allocation10], %s3104_s2, %s3104_s2, %s3105_s24  }
  0x57   :  { %s3106_s13 = smov [#allocation12]   ;;  %s3019_s19 = scalar_lea.hbm %s3415_s5, 768 }
  0x58   :  { %s80_s14 = sshll.u32 %s3106_s13, 4  ;;  %p3020_p12 = scmp.ne.s32.totalorder %s3415_s5, %s3019_s19  ;;  %s81_s14 = int_to_ptr.vmem [resolvable:$true] %s80_s14 }
  0x59   :  { %p3023_p13 = scmp.lt.u32.totalorder %s3019_s19, %s3415_s5 }
  0x5b   :  { %p3025_p0 = pnand %p3023_p13, %p3020_p12 }
  0x5d   :  { %3028 = shalt.err (!%p3025_p0)
}
  0x5e   :  { %s3029_s1 = scalar_lea.vmem %s81_s14, 768  ;;  %p3034_p2 = scmp.lt.s32.totalorder %s81_s14, %s81_s14 }
  0x5f   :  { %p3030_p1 = scmp.ne.s32.totalorder %s81_s14, %s3029_s1  ;;  %p3035_p3 = scmp.lt.s32.totalorder %s3029_s1, %s3029_s1 }
  0x61   :  { %p3036_p4 = por %p3035_p3, %p3034_p2 }
  0x63   :  { %p3037_p5 = pnand %p3036_p4, %p3030_p1 }
  0x65   :  { %3040 = shalt.err (!%p3037_p5)
}
  0x66   :  { %s3107_s4 = smov 256   ;;  %s3108_s18 = smov 16  }
  0x67   :  { %86 = dma.hbm_to_vmem [thread:$0]  %s3415_s5, 768, %s81_s14, [#allocation13], %s3107_s4, %s3107_s4, %s3108_s18  }
  0x68   :  { %3085 = dma.done.wait [#allocation4], 128  }
  0x69   :  { %3086 = vsyncadd [#allocation4], 4294967168 }
  0x6a   :  { %3087 = dma.done.wait [#allocation7], 2176  }
  0x6b   :  { %3088 = vsyncadd [#allocation7], 4294965120 }
  0x6c   :  { %3089 = dma.done.wait [#allocation10], 17408  }
  0x6d   :  { %3090 = vsyncadd [#allocation10], 4294949888 }
  0x6e   :  { %3091 = dma.done.wait [#allocation13], 768  }
  0x6f   :  { %3092 = vsyncadd [#allocation13], 4294966528  ;;  %v3109_v0 = vmov 0.0   ;;  %v2740_v1 = vld [vmem:[#allocation8 + $0x40] sm:$0xff]   ;;  %v2742_v3 = vld [vmem:[#allocation8 + $0x48] sm:$0xff]   ;;  %vm3110_vm0 = vmmov 0  }
  0x70   :  { %2422 = vmatprep.subr.bf16.mxu1 %v3109_v0  ;;  %1050 = vst [vmem:[#allocation2] sm:$0xff] %v3109_v0  ;;  %v2741_v2 = vld [vmem:[#allocation8] sm:$0xff]   ;;  %2265 = vmatprep.subr.bf16.mxu0 %v2740_v1  ;;  %v2743_v4 = vld [vmem:[#allocation8 + $0x8] sm:$0xff]   ;;  %v2744_v5 = vld [vmem:[#allocation8 + $0x50] sm:$0xff]   ;;  %vm1038_vm1 = vcmask 64512   ;;  %s3111_s5 = smov 126  }
  0x71   :  { %2266 = vmatpush3.bf16.msra.mxu0 %v2741_v2  ;;  %v2745_v6 = vld [vmem:[#allocation8 + $0x10] sm:$0xff]   ;;  %v2746_v7 = vld [vmem:[#allocation8 + $0x58] sm:$0xff]   ;;  %v2748_v9 = vld [vmem:[#allocation8 + $0x60] sm:$0xff]   ;;  %2438 = vmatprep.mubr.msk.bf16.mxu1 %vm3110_vm0, %v3109_v0  ;;  %vm1051_vm2 = vcmask 15360   ;;  %s3113_s16 = smov [#allocation15]  }
  0x72   :  { %2267 = vmatprep.subr.bf16.mxu0 %v2742_v3  ;;  %v2747_v8 = vld [vmem:[#allocation8 + $0x18] sm:$0xff]   ;;  %v2749_v10 = vld [vmem:[#allocation8 + $0x20] sm:$0xff]   ;;  %v2750_v11 = vld [vmem:[#allocation8 + $0x68] sm:$0xff]   ;;  %s2095_s27 = sshll.u32 %s3113_s16, 4  ;;  %s2096_s27 = int_to_ptr.vmem [resolvable:$true] %s2095_s27 }
  0x73   :  { %v106_v12 = vld [vmem:[#allocation3] sm:$0xff]  ;;  %v2758_v14 = vld [vmem:[#allocation9] sm:$0xff]   ;;  %v2751_v15 = vld [vmem:[#allocation8 + $0x28] sm:$0xff]   ;;  %s3041_s28 = scalar_lea.vmem %s2096_s27, 128  ;;  %p3046_p7 = scmp.lt.s32.totalorder %s2096_s27, %s2096_s27 }
  0x74   :  { %v2112_v13 = vcombine.high %v106_v12, %v106_v12  ;;  %v2752_v16 = vld [vmem:[#allocation8 + $0x70] sm:$0xff]   ;;  %2423 = vmatpush3.bf16.msra.mxu1 %v2758_v14  ;;  %v2759_v17 = vld [vmem:[#allocation9 + $0x8] sm:$0xff]   ;;  %v2754_v19 = vld [vmem:[#allocation8 + $0x78] sm:$0xff]   ;;  %v2111_v23 = vcombine.low %v106_v12, %v106_v12  ;;  %p3042_p6 = scmp.ne.s32.totalorder %s2096_s27, %s3041_s28  ;;  %p3047_p8 = scmp.lt.s32.totalorder %s3041_s28, %s3041_s28 }
  0x75   :  { %2268 = vmatpush3.bf16.msra.mxu0 %v2743_v4  ;;  %v2753_v18 = vld [vmem:[#allocation8 + $0x30] sm:$0xff]   ;;  %2424 = vmatprep.subr.bf16.mxu1 %v3109_v0  ;;  %v2755_v21 = vld [vmem:[#allocation8 + $0x38] sm:$0xff]   ;;  %v2762_v24 = vld [vmem:[#allocation9 + $0x20] sm:$0xff]  }
  0x76   :  { %2269 = vmatprep.subr.bf16.mxu0 %v2744_v5  ;;  %275 = vmatprep.mubr.bf16.mxu0 %v2112_v13  ;;  %v2760_v20 = vld [vmem:[#allocation9 + $0x10] sm:$0xff]   ;;  %v2761_v22 = vld [vmem:[#allocation9 + $0x18] sm:$0xff]   ;;  %v2763_v25 = vld [vmem:[#allocation9 + $0x28] sm:$0xff]   ;;  %p3048_p9 = por %p3047_p8, %p3046_p7 }
  0x77   :  { %v2764_v26 = vld [vmem:[#allocation9 + $0x30] sm:$0xff]   ;;  %v2765_v27 = vld [vmem:[#allocation9 + $0x38] sm:$0xff]   ;;  %v2766_v28 = vld [vmem:[#allocation9 + $0x40] sm:$0xff]  }
  0x78   :  { %2425 = vmatpush3.bf16.msra.mxu1 %v2759_v17  ;;  %v2767_v29 = vld [vmem:[#allocation9 + $0x48] sm:$0xff]   ;;  %v2768_v30 = vld [vmem:[#allocation9 + $0x50] sm:$0xff]   ;;  %v2769_v31 = vld [vmem:[#allocation9 + $0x58] sm:$0xff]   ;;  %p3049_p10 = pnand %p3048_p9, %p3042_p6 }
  0x79   :  { %2270 = vmatpush3.bf16.msra.mxu0 %v2745_v6  ;;  %2426 = vmatprep.subr.bf16.mxu1 %v3109_v0  ;;  %v2770_v32 = vld [vmem:[#allocation9 + $0x60] sm:$0xff]   ;;  %v2771_v33 = vld [vmem:[#allocation9 + $0x68] sm:$0xff]   ;;  %v2772_v43 = vld [vmem:[#allocation9 + $0x70] sm:$0xff]  }
  0x7a   :  { %2271 = vmatprep.subr.bf16.mxu0 %v2746_v7  ;;  %v139_v35 = vld [vmem:[#allocation12] ss:$0 sm:$0xff]  ;;  %v2773_v44 = vld [vmem:[#allocation9 + $0x78] sm:$0xff]   ;;  %v2775_v46 = vld [vmem:[#allocation9 + $0x88] sm:$0xff]  }
  0x7b   :  { %v2774_v45 = vld [vmem:[#allocation9 + $0x80] sm:$0xff]   ;;  %v2776_v47 = vld [vmem:[#allocation9 + $0x90] sm:$0xff]   ;;  %v2777_v48 = vld [vmem:[#allocation9 + $0x98] sm:$0xff]  }
  0x7c   :  { %2427 = vmatpush3.bf16.msra.mxu1 %v2760_v20  ;;  %v2778_v49 = vld [vmem:[#allocation9 + $0xa0] sm:$0xff]   ;;  %v2779_v50 = vld [vmem:[#allocation9 + $0xa8] sm:$0xff]   ;;  %v2780_v59 = vld [vmem:[#allocation9 + $0xb0] sm:$0xff]  }
  0x7d   :  { %2272 = vmatpush3.bf16.msra.mxu0 %v2747_v8  ;;  %2428 = vmatprep.subr.bf16.mxu1 %v3109_v0  ;;  %v301_v51 = vld [vmem:[#allocation12 + $0x1] ss:$0 sm:$0xff]  ;;  %v2781_v60 = vld [vmem:[#allocation9 + $0xb8] sm:$0xff]   ;;  %v2783_v62 = vld [vmem:[#allocation9 + $0xc8] sm:$0xff]  }
  0x7e   :  { %2273 = vmatprep.subr.bf16.mxu0 %v2748_v9  ;;  %v2782_v61 = vld [vmem:[#allocation9 + $0xc0] sm:$0xff]   ;;  %v2784_v63 = vld [vmem:[#allocation9 + $0xd0] sm:$0xff]   ;;  %v2785_v1 = vld [vmem:[#allocation9 + $0xd8] sm:$0xff]  }
  0x7f   :  { %v2786_v2 = vld [vmem:[#allocation9 + $0xe0] sm:$0xff]   ;;  %v2787_v3 = vld [vmem:[#allocation9 + $0xe8] sm:$0xff]   ;;  %v2788_v12 = vld [vmem:[#allocation9 + $0xf0] sm:$0xff]  }
  0x80   :  { %2429 = vmatpush3.bf16.msra.mxu1 %v2761_v22  ;;  %v409_v4 = vld [vmem:[#allocation12 + $0x2] ss:$0 sm:$0xff]  ;;  %v2789_v13 = vld [vmem:[#allocation9 + $0xf8] sm:$0xff]   ;;  %v517_v20 = vld [vmem:[#allocation12 + $0x3] ss:$0 sm:$0xff] }
  0x81   :  { %2274 = vmatpush3.bf16.msra.mxu0 %v2749_v10  ;;  %2430 = vmatprep.subr.bf16.mxu1 %v3109_v0  ;;  %v2790_v14 = vld [vmem:[#allocation9 + $0x100] sm:$0xff]   ;;  %v2793_v17 = vld [vmem:[#allocation9 + $0x118] sm:$0xff]  }
  0x82   :  { %2275 = vmatprep.subr.bf16.mxu0 %v2750_v11 }
  0x84   :  { %2431 = vmatpush3.bf16.msra.mxu1 %v2762_v24 }
  0x85   :  { %2276 = vmatpush3.bf16.msra.mxu0 %v2751_v15  ;;  %2432 = vmatprep.subr.bf16.mxu1 %v3109_v0  ;;  %v2791_v15 = vld [vmem:[#allocation9 + $0x108] sm:$0xff]  }
  0x86   :  { %2277 = vmatprep.subr.bf16.mxu0 %v2752_v16  ;;  %v2792_v16 = vld [vmem:[#allocation9 + $0x110] sm:$0xff]  }
  0x88   :  { %2433 = vmatpush3.bf16.msra.mxu1 %v2763_v25 }
  0x89   :  { %2278 = vmatpush3.bf16.msra.mxu0 %v2753_v18  ;;  %2434 = vmatprep.subr.bf16.mxu1 %v3109_v0  ;;  %v2794_v18 = vld [vmem:[#allocation9 + $0x120] sm:$0xff]  }
  0x8a   :  { %2279 = vmatprep.subr.bf16.mxu0 %v2754_v19  ;;  %v2795_v19 = vld [vmem:[#allocation9 + $0x128] sm:$0xff]  }
  0x8c   :  { %2435 = vmatpush3.bf16.msra.mxu1 %v2764_v26 }
  0x8d   :  { %2280 = vmatpush3.bf16.msra.mxu0 %v2755_v21  ;;  %2436 = vmatprep.subr.bf16.mxu1 %v3109_v0 }
  0x8e   :  { %2442 = vmatprep.subr.bf16.mxu0 %v3109_v0 }
  0x90   :  { %276 = vmatmul.mubr.bf16.vlgmr.msra.gmra.mrb[0].mxu0 %v2111_v23  ;;  %2437 = vmatpush3.bf16.msra.mxu1 %v2765_v27 }
  0x91   :  { %2462 = vmatprep.subr.bf16.mxu1 %v3109_v0  ;;  %2458 = vmatprep.mubr.msk.bf16.mxu0 %vm3110_vm0, %v3109_v0 }
  0x92   :  { %2443 = vmatpush3.bf16.msra.mxu0 %v2766_v28  ;;  %v2796_v28 = vld [vmem:[#allocation9 + $0x130] sm:$0xff]  }
  0x93   :  { %2444 = vmatprep.subr.bf16.mxu0 %v3109_v0 }
  0x96   :  { %2445 = vmatpush3.bf16.msra.mxu0 %v2767_v29  ;;  %v2797_v29 = vld [vmem:[#allocation9 + $0x138] sm:$0xff]  }
  0x97   :  { %2446 = vmatprep.subr.bf16.mxu0 %v3109_v0 }
  0x9a   :  { %2447 = vmatpush3.bf16.msra.mxu0 %v2768_v30  ;;  %v2798_v30 = vld [vmem:[#allocation9 + $0x140] sm:$0xff]  }
  0x9b   :  { %2448 = vmatprep.subr.bf16.mxu0 %v3109_v0 }
  0x9e   :  { %2449 = vmatpush3.bf16.msra.mxu0 %v2769_v31  ;;  %v2799_v31 = vld [vmem:[#allocation9 + $0x148] sm:$0xff]  }
  0x9f   :  { %2450 = vmatprep.subr.bf16.mxu0 %v3109_v0 }
  0xa2   :  { %2451 = vmatpush3.bf16.msra.mxu0 %v2770_v32  ;;  %v2800_v32 = vld [vmem:[#allocation9 + $0x150] sm:$0xff]  }
  0xa3   :  { %2452 = vmatprep.subr.bf16.mxu0 %v3109_v0 }
  0xa6   :  { %2453 = vmatpush3.bf16.msra.mxu0 %v2771_v33  ;;  %v2801_v33 = vld [vmem:[#allocation9 + $0x158] sm:$0xff]  }
  0xa7   :  { %2454 = vmatprep.subr.bf16.mxu0 %v3109_v0 }
  0xaa   :  { %2455 = vmatpush3.bf16.msra.mxu0 %v2772_v43 }
  0xab   :  { %2456 = vmatprep.subr.bf16.mxu0 %v3109_v0 }
  0xae   :  { %2457 = vmatpush3.bf16.msra.mxu0 %v2773_v44  ;;  %v3294_v44 = vld [vmem:[#allocation2] sm:$0xff] }
  0xaf   :  { %2482 = vmatprep.subr.bf16.mxu0 %v3109_v0 }
 0x163   :  { %v2281_v34 = vpop.f32.mrb[0].mxu0 }
 0x164   :  { %v2282_v36 = vpop.f32.mrb[1].mxu0 }
 0x165   :  { %v2283_v37 = vadd.f32 %v2282_v36, %v2281_v34  ;;  %v2284_v38 = vpop.f32.mrb[2].mxu0  ;;  %v2802_v34 = vld [vmem:[#allocation9 + $0x160] sm:$0xff]  }
 0x166   :  { %v2285_v39 = vpop.f32.mrb[3].mxu0  ;;  %v625_v36 = vld [vmem:[#allocation12 + $0x4] ss:$0 sm:$0xff] }
 0x167   :  { %v278_v40 = vadd.f32 %v2283_v37, %v139_v35  ;;  %v2803_v35 = vld [vmem:[#allocation9 + $0x168] sm:$0xff]  }
 0x169   :  { %v283_v41 = vmax.f32 %v278_v40, 0.0 }
 0x16b   :  { %v284_v42 = vpack.c.bf16 %v283_v41, %v283_v41 }
 0x16d   :  { %2439 = vmatmul.mubr.bf16.vlgmr.msra.gmra.mrb[0].mxu1 %v284_v42 }
 0x16e   :  { %2478 = vmatprep.mubr.msk.bf16.mxu1 %vm3110_vm0, %v3109_v0  ;;  %2463 = vmatpush3.bf16.msra.mxu1 %v2774_v45  ;;  %v2804_v45 = vld [vmem:[#allocation9 + $0x170] sm:$0xff]  }
 0x16f   :  { %2464 = vmatprep.subr.bf16.mxu1 %v3109_v0 }
 0x172   :  { %2465 = vmatpush3.bf16.msra.mxu1 %v2775_v46  ;;  %v2805_v46 = vld [vmem:[#allocation9 + $0x178] sm:$0xff]  }
 0x173   :  { %2466 = vmatprep.subr.bf16.mxu1 %v3109_v0 }
 0x176   :  { %2467 = vmatpush3.bf16.msra.mxu1 %v2776_v47  ;;  %v2807_v47 = vld [vmem:[#allocation9 + $0x188] sm:$0xff]  }
 0x177   :  { %2468 = vmatprep.subr.bf16.mxu1 %v3109_v0 }
 0x17a   :  { %2469 = vmatpush3.bf16.msra.mxu1 %v2777_v48  ;;  %v2808_v48 = vld [vmem:[#allocation9 + $0x190] sm:$0xff]  }
 0x17b   :  { %2470 = vmatprep.subr.bf16.mxu1 %v3109_v0 }
 0x17e   :  { %2471 = vmatpush3.bf16.msra.mxu1 %v2778_v49  ;;  %v2809_v49 = vld [vmem:[#allocation9 + $0x198] sm:$0xff]  }
 0x17f   :  { %2472 = vmatprep.subr.bf16.mxu1 %v3109_v0 }
 0x182   :  { %2473 = vmatpush3.bf16.msra.mxu1 %v2779_v50  ;;  %v2810_v50 = vld [vmem:[#allocation9 + $0x1a0] sm:$0xff]  }
 0x183   :  { %2474 = vmatprep.subr.bf16.mxu1 %v3109_v0 }
 0x186   :  { %2475 = vmatpush3.bf16.msra.mxu1 %v2780_v59 }
 0x187   :  { %2476 = vmatprep.subr.bf16.mxu1 %v3109_v0 }
 0x18a   :  { %2477 = vmatpush3.bf16.msra.mxu1 %v2781_v60  ;;  %v2812_v60 = vld [vmem:[#allocation9 + $0x1b0] sm:$0xff]  }
 0x18b   :  { %2502 = vmatprep.subr.bf16.mxu1 %v3109_v0 }
 0x240   :  { %v384_v52 = vpop.f32.mrb[0].mxu1 }
 0x241   :  { %v385_v53 = vadd.f32 %v384_v52, %v301_v51  ;;  %v2440_v54 = vpop.f32.mrb[1].mxu1  ;;  %v2811_v51 = vld [vmem:[#allocation9 + $0x1a8] sm:$0xff]   ;;  %v733_v52 = vld [vmem:[#allocation12 + $0x5] ss:$0 sm:$0xff] }
 0x242   :  { %v387_v55 = vpop.f32.mrb[2].mxu1 }
 0x243   :  { %v390_v56 = vmax.f32 %v385_v53, 0.0  ;;  %v2441_v57 = vpop.f32.mrb[3].mxu1 }
 0x245   :  { %v391_v58 = vpack.c.bf16 %v390_v56, %v390_v56 }
 0x247   :  { %2459 = vmatmul.mubr.bf16.vlgmr.msra.gmra.mrb[4].mxu0 %v391_v58 }
 0x248   :  { %2498 = vmatprep.mubr.msk.bf16.mxu0 %vm3110_vm0, %v3109_v0  ;;  %2483 = vmatpush3.bf16.msra.mxu0 %v2782_v61  ;;  %v2813_v61 = vld [vmem:[#allocation9 + $0x1b8] sm:$0xff]  }
 0x249   :  { %2484 = vmatprep.subr.bf16.mxu0 %v3109_v0 }
 0x24c   :  { %2485 = vmatpush3.bf16.msra.mxu0 %v2783_v62  ;;  %v841_v62 = vld [vmem:[#allocation12 + $0x6] ss:$0 sm:$0xff] }
 0x24d   :  { %2486 = vmatprep.subr.bf16.mxu0 %v3109_v0 }
 0x250   :  { %2487 = vmatpush3.bf16.msra.mxu0 %v2784_v63 }
 0x251   :  { %2488 = vmatprep.subr.bf16.mxu0 %v3109_v0 }
 0x254   :  { %2489 = vmatpush3.bf16.msra.mxu0 %v2785_v1 }
 0x255   :  { %2490 = vmatprep.subr.bf16.mxu0 %v3109_v0 }
 0x258   :  { %2491 = vmatpush3.bf16.msra.mxu0 %v2786_v2 }
 0x259   :  { %2492 = vmatprep.subr.bf16.mxu0 %v3109_v0 }
 0x25c   :  { %2493 = vmatpush3.bf16.msra.mxu0 %v2787_v3 }
 0x25d   :  { %2494 = vmatprep.subr.bf16.mxu0 %v3109_v0 }
 0x260   :  { %2495 = vmatpush3.bf16.msra.mxu0 %v2788_v12 }
 0x261   :  { %2496 = vmatprep.subr.bf16.mxu0 %v3109_v0 }
 0x264   :  { %2497 = vmatpush3.bf16.msra.mxu0 %v2789_v13 }
 0x265   :  { %2522 = vmatprep.subr.bf16.mxu0 %v3109_v0 }
 0x31a   :  { %v492_v5 = vpop.f32.mrb[4].mxu0 }
 0x31b   :  { %v493_v6 = vadd.f32 %v492_v5, %v409_v4  ;;  %v2460_v7 = vpop.f32.mrb[5].mxu0 }
 0x31c   :  { %v495_v8 = vpop.f32.mrb[6].mxu0  ;;  %v2814_v7 = vld [vmem:[#allocation9 + $0x1c0] sm:$0xff]  }
 0x31d   :  { %v498_v9 = vmax.f32 %v493_v6, 0.0  ;;  %v2461_v10 = vpop.f32.mrb[7].mxu0  ;;  %v2815_v8 = vld [vmem:[#allocation9 + $0x1c8] sm:$0xff]  }
 0x31e   :  { %v2817_v10 = vld [vmem:[#allocation9 + $0x1d8] sm:$0xff]  }
 0x31f   :  { %v499_v11 = vpack.c.bf16 %v498_v9, %v498_v9  ;;  %v2816_v9 = vld [vmem:[#allocation9 + $0x1d0] sm:$0xff]  }
 0x321   :  { %2479 = vmatmul.mubr.bf16.vlgmr.msra.gmra.mrb[4].mxu1 %v499_v11  ;;  %v949_v11 = vld [vmem:[#allocation12 + $0x7] ss:$0 sm:$0xff] }
 0x322   :  { %2518 = vmatprep.mubr.msk.bf16.mxu1 %vm3110_vm0, %v3109_v0  ;;  %2503 = vmatpush3.bf16.msra.mxu1 %v2790_v14 }
 0x323   :  { %2504 = vmatprep.subr.bf16.mxu1 %v3109_v0 }
 0x326   :  { %2505 = vmatpush3.bf16.msra.mxu1 %v2791_v15 }
 0x327   :  { %2506 = vmatprep.subr.bf16.mxu1 %v3109_v0 }
 0x32a   :  { %2507 = vmatpush3.bf16.msra.mxu1 %v2792_v16  ;;  %v2818_v16 = vld [vmem:[#allocation9 + $0x1e0] sm:$0xff]  }
 0x32b   :  { %2508 = vmatprep.subr.bf16.mxu1 %v3109_v0 }
 0x32e   :  { %2509 = vmatpush3.bf16.msra.mxu1 %v2793_v17 }
 0x32f   :  { %2510 = vmatprep.subr.bf16.mxu1 %v3109_v0 }
 0x332   :  { %2511 = vmatpush3.bf16.msra.mxu1 %v2794_v18 }
 0x333   :  { %2512 = vmatprep.subr.bf16.mxu1 %v3109_v0 }
 0x336   :  { %2513 = vmatpush3.bf16.msra.mxu1 %v2795_v19 }
 0x337   :  { %2514 = vmatprep.subr.bf16.mxu1 %v3109_v0 }
 0x33a   :  { %2515 = vmatpush3.bf16.msra.mxu1 %v2796_v28  ;;  %v2826_v28 = vld [vmem:[#allocation9 + $0x220] sm:$0xff]  }
 0x33b   :  { %2516 = vmatprep.subr.bf16.mxu1 %v3109_v0 }
 0x33e   :  { %2517 = vmatpush3.bf16.msra.mxu1 %v2797_v29  ;;  %v2827_v29 = vld [vmem:[#allocation9 + $0x228] sm:$0xff]  }
 0x33f   :  { %2542 = vmatprep.subr.bf16.mxu1 %v3109_v0 }
 0x3f4   :  { %v600_v21 = vpop.f32.mrb[4].mxu1 }
 0x3f5   :  { %v601_v22 = vadd.f32 %v600_v21, %v517_v20  ;;  %v2480_v23 = vpop.f32.mrb[5].mxu1  ;;  %v2819_v20 = vld [vmem:[#allocation9 + $0x1e8] sm:$0xff]   ;;  %v2820_v21 = vld [vmem:[#allocation9 + $0x1f0] sm:$0xff]  }
 0x3f6   :  { %v603_v24 = vpop.f32.mrb[6].mxu1 }
 0x3f7   :  { %v606_v25 = vmax.f32 %v601_v22, 0.0  ;;  %v2481_v26 = vpop.f32.mrb[7].mxu1  ;;  %v2821_v22 = vld [vmem:[#allocation9 + $0x1f8] sm:$0xff]   ;;  %v2822_v24 = vld [vmem:[#allocation9 + $0x200] sm:$0xff]  }
 0x3f8   :  { %v2824_v26 = vld [vmem:[#allocation9 + $0x210] sm:$0xff]  }
 0x3f9   :  { %v607_v27 = vpack.c.bf16 %v606_v25, %v606_v25  ;;  %v2823_v25 = vld [vmem:[#allocation9 + $0x208] sm:$0xff]  }
 0x3fb   :  { %2499 = vmatmul.mubr.bf16.vlgmr.msra.gmra.mrb[8].mxu0 %v607_v27  ;;  %v2825_v27 = vld [vmem:[#allocation9 + $0x218] sm:$0xff]  }
 0x3fc   :  { %2538 = vmatprep.mubr.msk.bf16.mxu0 %vm3110_vm0, %v3109_v0  ;;  %2523 = vmatpush3.bf16.msra.mxu0 %v2798_v30  ;;  %v1040_v30 = vld [vmem:[#allocation6] sm:$0xff] }
 0x3fd   :  { %2524 = vmatprep.subr.bf16.mxu0 %v3109_v0 }
 0x400   :  { %2525 = vmatpush3.bf16.msra.mxu0 %v2799_v31 }
 0x401   :  { %2526 = vmatprep.subr.bf16.mxu0 %v3109_v0 }
 0x404   :  { %2527 = vmatpush3.bf16.msra.mxu0 %v2800_v32 }
 0x405   :  { %2528 = vmatprep.subr.bf16.mxu0 %v3109_v0 }
 0x408   :  { %2529 = vmatpush3.bf16.msra.mxu0 %v2801_v33 }
 0x409   :  { %2530 = vmatprep.subr.bf16.mxu0 %v3109_v0 }
 0x40c   :  { %2531 = vmatpush3.bf16.msra.mxu0 %v2802_v34 }
 0x40d   :  { %2532 = vmatprep.subr.bf16.mxu0 %v3109_v0 }
 0x410   :  { %2533 = vmatpush3.bf16.msra.mxu0 %v2803_v35 }
 0x411   :  { %2534 = vmatprep.subr.bf16.mxu0 %v3109_v0  ;;  %v2806_v0 = vld [vmem:[#allocation9 + $0x180] sm:$0xff]  }
 0x414   :  { %2535 = vmatpush3.bf16.msra.mxu0 %v2804_v45  ;;  %v1072_v45 = vld [vmem:[#allocation12 + $0x10] ss:$0 sm:$0xff] }
 0x415   :  { %2536 = vmatprep.subr.bf16.mxu0 %v3294_v44 }
 0x418   :  { %2537 = vmatpush3.bf16.msra.mxu0 %v2805_v46 }
 0x419   :  { %2562 = vmatprep.subr.bf16.mxu0 %v3294_v44 }
 0x4ce   :  { %v708_v37 = vpop.f32.mrb[8].mxu0 }
 0x4cf   :  { %v709_v38 = vadd.f32 %v708_v37, %v625_v36  ;;  %v2500_v39 = vpop.f32.mrb[9].mxu0  ;;  %v2828_v36 = vld [vmem:[#allocation9 + $0x230] sm:$0xff]   ;;  %v2829_v37 = vld [vmem:[#allocation9 + $0x238] sm:$0xff]  }
 0x4d0   :  { %v711_v40 = vpop.f32.mrb[10].mxu0  ;;  %v2831_v39 = vld [vmem:[#allocation9 + $0x248] sm:$0xff]  }
 0x4d1   :  { %v714_v41 = vmax.f32 %v709_v38, 0.0  ;;  %v2501_v42 = vpop.f32.mrb[11].mxu0  ;;  %v2830_v38 = vld [vmem:[#allocation9 + $0x240] sm:$0xff]   ;;  %v2832_v40 = vld [vmem:[#allocation9 + $0x250] sm:$0xff]  }
 0x4d2   :  { %v2834_v42 = vld [vmem:[#allocation9 + $0x260] sm:$0xff]  }
 0x4d3   :  { %v715_v43 = vpack.c.bf16 %v714_v41, %v714_v41  ;;  %v2833_v41 = vld [vmem:[#allocation9 + $0x258] sm:$0xff]  }
 0x4d5   :  { %2519 = vmatmul.mubr.bf16.vlgmr.msra.gmra.mrb[8].mxu1 %v715_v43  ;;  %v2835_v43 = vld [vmem:[#allocation9 + $0x268] sm:$0xff]  }
 0x4d6   :  { %2558 = vmatprep.mubr.msk.bf16.mxu1 %vm3110_vm0, %v3294_v44  ;;  %2543 = vmatpush3.bf16.msra.mxu1 %v2806_v0 }
 0x4d7   :  { %2544 = vmatprep.subr.bf16.mxu1 %v3294_v44 }
 0x4da   :  { %2545 = vmatpush3.bf16.msra.mxu1 %v2807_v47 }
 0x4db   :  { %2546 = vmatprep.subr.bf16.mxu1 %v3294_v44 }
 0x4de   :  { %2547 = vmatpush3.bf16.msra.mxu1 %v2808_v48 }
 0x4df   :  { %2548 = vmatprep.subr.bf16.mxu1 %v3294_v44 }
 0x4e2   :  { %2549 = vmatpush3.bf16.msra.mxu1 %v2809_v49 }
 0x4e3   :  { %2550 = vmatprep.subr.bf16.mxu1 %v3294_v44 }
 0x4e6   :  { %2551 = vmatpush3.bf16.msra.mxu1 %v2810_v50 }
 0x4e7   :  { %2552 = vmatprep.subr.bf16.mxu1 %v3294_v44 }
 0x4ea   :  { %2553 = vmatpush3.bf16.msra.mxu1 %v2811_v51 }
 0x4eb   :  { %2554 = vmatprep.subr.bf16.mxu1 %v3294_v44 }
 0x4ee   :  { %2555 = vmatpush3.bf16.msra.mxu1 %v2812_v60  ;;  %v1180_v60 = vld [vmem:[#allocation12 + $0x11] ss:$0 sm:$0xff] }
 0x4ef   :  { %2556 = vmatprep.subr.bf16.mxu1 %v3294_v44 }
 0x4f2   :  { %2557 = vmatpush3.bf16.msra.mxu1 %v2813_v61 }
 0x4f3   :  { %2582 = vmatprep.subr.bf16.mxu1 %v3294_v44 }
 0x5a8   :  { %v816_v53 = vpop.f32.mrb[8].mxu1 }
 0x5a9   :  { %v817_v54 = vadd.f32 %v816_v53, %v733_v52  ;;  %v2520_v55 = vpop.f32.mrb[9].mxu1  ;;  %v2836_v52 = vld [vmem:[#allocation9 + $0x270] sm:$0xff]   ;;  %v2837_v53 = vld [vmem:[#allocation9 + $0x278] sm:$0xff]  }
 0x5aa   :  { %v819_v56 = vpop.f32.mrb[10].mxu1  ;;  %v2839_v55 = vld [vmem:[#allocation9 + $0x288] sm:$0xff]  }
 0x5ab   :  { %v822_v57 = vmax.f32 %v817_v54, 0.0  ;;  %v2521_v58 = vpop.f32.mrb[11].mxu1  ;;  %v2838_v54 = vld [vmem:[#allocation9 + $0x280] sm:$0xff]   ;;  %v2840_v56 = vld [vmem:[#allocation9 + $0x290] sm:$0xff]  }
 0x5ac   :  { %v2842_v58 = vld [vmem:[#allocation9 + $0x2a0] sm:$0xff]  }
 0x5ad   :  { %v823_v59 = vpack.c.bf16 %v822_v57, %v822_v57  ;;  %v2841_v57 = vld [vmem:[#allocation9 + $0x298] sm:$0xff]  }
 0x5af   :  { %2539 = vmatmul.mubr.bf16.vlgmr.msra.gmra.mrb[12].mxu0 %v823_v59  ;;  %v2843_v59 = vld [vmem:[#allocation9 + $0x2a8] sm:$0xff]  }
 0x5b0   :  { %2578 = vmatprep.mubr.msk.bf16.mxu0 %vm3110_vm0, %v3294_v44  ;;  %2563 = vmatpush3.bf16.msra.mxu0 %v2814_v7  ;;  %v2846_v7 = vld [vmem:[#allocation9 + $0x2c0] sm:$0xff]  }
 0x5b1   :  { %2564 = vmatprep.subr.bf16.mxu0 %v3294_v44 }
 0x5b4   :  { %2565 = vmatpush3.bf16.msra.mxu0 %v2815_v8  ;;  %v2847_v8 = vld [vmem:[#allocation9 + $0x2c8] sm:$0xff]  }
 0x5b5   :  { %2566 = vmatprep.subr.bf16.mxu0 %v3294_v44 }
 0x5b8   :  { %2567 = vmatpush3.bf16.msra.mxu0 %v2816_v9  ;;  %v2848_v9 = vld [vmem:[#allocation9 + $0x2d0] sm:$0xff]  }
 0x5b9   :  { %2568 = vmatprep.subr.bf16.mxu0 %v3294_v44 }
 0x5bc   :  { %2569 = vmatpush3.bf16.msra.mxu0 %v2817_v10  ;;  %v2849_v10 = vld [vmem:[#allocation9 + $0x2d8] sm:$0xff]  }
 0x5bd   :  { %2570 = vmatprep.subr.bf16.mxu0 %v3294_v44 }
 0x5c0   :  { %2571 = vmatpush3.bf16.msra.mxu0 %v2818_v16 }
 0x5c1   :  { %2572 = vmatprep.subr.bf16.mxu0 %v3294_v44 }
 0x5c4   :  { %2573 = vmatpush3.bf16.msra.mxu0 %v2819_v20 }
 0x5c5   :  { %2574 = vmatprep.subr.bf16.mxu0 %v3294_v44 }
 0x5c8   :  { %2575 = vmatpush3.bf16.msra.mxu0 %v2820_v21  ;;  %v2852_v21 = vld [vmem:[#allocation9 + $0x2f0] sm:$0xff]  }
 0x5c9   :  { %2576 = vmatprep.subr.bf16.mxu0 %v3294_v44 }
 0x5cc   :  { %2577 = vmatpush3.bf16.msra.mxu0 %v2821_v22  ;;  %v2853_v22 = vld [vmem:[#allocation9 + $0x2f8] sm:$0xff]  }
 0x5cd   :  { %2602 = vmatprep.subr.bf16.mxu0 %v3294_v44 }
 0x682   :  { %v924_v63 = vpop.f32.mrb[12].mxu0 }
 0x683   :  { %v925_v1 = vadd.f32 %v924_v63, %v841_v62  ;;  %v2540_v2 = vpop.f32.mrb[13].mxu0 }
 0x684   :  { %v927_v3 = vpop.f32.mrb[14].mxu0 }
 0x685   :  { %v930_v4 = vmax.f32 %v925_v1, 0.0  ;;  %v2541_v5 = vpop.f32.mrb[15].mxu0 }
 0x686   :  { %v2844_v5 = vld [vmem:[#allocation9 + $0x2b0] sm:$0xff]  }
 0x687   :  { %v931_v6 = vpack.c.bf16 %v930_v4, %v930_v4 }
 0x689   :  { %2559 = vmatmul.mubr.bf16.vlgmr.msra.gmra.mrb[12].mxu1 %v931_v6  ;;  %v2845_v6 = vld [vmem:[#allocation9 + $0x2b8] sm:$0xff]  }
 0x68a   :  { %2598 = vmatprep.mubr.msk.bf16.mxu1 %vm3110_vm0, %v3294_v44  ;;  %2583 = vmatpush3.bf16.msra.mxu1 %v2822_v24  ;;  %v2855_v24 = vld [vmem:[#allocation9 + $0x308] sm:$0xff]  }
 0x68b   :  { %2584 = vmatprep.subr.bf16.mxu1 %v3294_v44 }
 0x68e   :  { %2585 = vmatpush3.bf16.msra.mxu1 %v2823_v25  ;;  %v2856_v25 = vld [vmem:[#allocation9 + $0x310] sm:$0xff]  }
 0x68f   :  { %2586 = vmatprep.subr.bf16.mxu1 %v3294_v44 }
 0x692   :  { %2587 = vmatpush3.bf16.msra.mxu1 %v2824_v26  ;;  %v2857_v26 = vld [vmem:[#allocation9 + $0x318] sm:$0xff]  }
 0x693   :  { %2588 = vmatprep.subr.bf16.mxu1 %v3294_v44 }
 0x696   :  { %2589 = vmatpush3.bf16.msra.mxu1 %v2825_v27  ;;  %v2858_v27 = vld [vmem:[#allocation9 + $0x320] sm:$0xff]  }
 0x697   :  { %2590 = vmatprep.subr.bf16.mxu1 %v3294_v44 }
 0x69a   :  { %2591 = vmatpush3.bf16.msra.mxu1 %v2826_v28  ;;  %v2859_v28 = vld [vmem:[#allocation9 + $0x328] sm:$0xff]  }
 0x69b   :  { %2592 = vmatprep.subr.bf16.mxu1 %v3294_v44 }
 0x69e   :  { %2593 = vmatpush3.bf16.msra.mxu1 %v2827_v29  ;;  %v1396_v29 = vld [vmem:[#allocation12 + $0x13] ss:$0 sm:$0xff] }
 0x69f   :  { %2594 = vmatprep.subr.bf16.mxu1 %v3294_v44 }
 0x6a2   :  { %2595 = vmatpush3.bf16.msra.mxu1 %v2828_v36 }
 0x6a3   :  { %2596 = vmatprep.subr.bf16.mxu1 %v3294_v44 }
 0x6a6   :  { %2597 = vmatpush3.bf16.msra.mxu1 %v2829_v37  ;;  %v2860_v37 = vld [vmem:[#allocation9 + $0x330] sm:$0xff]  }
 0x6a7   :  { %2622 = vmatprep.subr.bf16.mxu1 %v3294_v44 }
 0x75c   :  { %v1032_v12 = vpop.f32.mrb[12].mxu1 }
 0x75d   :  { %v1033_v13 = vadd.f32 %v1032_v12, %v949_v11  ;;  %v2560_v14 = vpop.f32.mrb[13].mxu1  ;;  %v2850_v11 = vld [vmem:[#allocation9 + $0x2e0] sm:$0xff]   ;;  %v2851_v12 = vld [vmem:[#allocation9 + $0x2e8] sm:$0xff]  }
 0x75e   :  { %v1035_v15 = vpop.f32.mrb[14].mxu1 }
 0x75f   :  { %v1041_v17 = vmul.f32 0.5, %v1033_v13  ;;  %v2561_v18 = vpop.f32.mrb[15].mxu1  ;;  %1039 = vst.msk [vmem:[#allocation15] sm:$0xff] %vm1038_vm1, %v1033_v13 }
 0x761   :  { %v1042_v19 = vmul.f32 1.442695, %v1041_v17 }
 0x763   :  { %2902 = vpow2.f32 %v1042_v19 }
 0x76d   :  { %v2903_v23 = vpop.eup %2902 }
 0x76e   :  { %1045 = vrot.lane.b32.xlu0 %v2903_v23, %s3111_s5  ;;  %v2854_v23 = vld [vmem:[#allocation9 + $0x300] sm:$0xff]  }
 0x7e0   :  { %v1046_v31 = vpop.permute.xlu0 %1045 }
 0x7e1   :  { %v1048_v32 = vmul.f32 %v1046_v31, %v1040_v30 }
 0x7e3   :  { %v1049_v33 = vadd.f32 %v1048_v32, %v1033_v13  ;;  %v1288_v13 = vld [vmem:[#allocation12 + $0x12] ss:$0 sm:$0xff] }
 0x7e5   :  { %1052 = vst.msk [vmem:[#allocation2] sm:$0xff] %vm1051_vm2, %v1049_v33 }
 0x7ec   :  { %v1053_v34 = vld [vmem:[#allocation2] sm:$0xff] }
 0x7ed   :  { %v1054_v35 = vpack.c.bf16 %v1053_v34, %v1053_v34 }
 0x7ef   :  { %2579 = vmatmul.mubr.bf16.vlgmr.msra.gmra.mrb[16].mxu0 %v1054_v35 }
 0x7f0   :  { %2618 = vmatprep.mubr.msk.bf16.mxu0 %vm3110_vm0, %v3294_v44  ;;  %2603 = vmatpush3.bf16.msra.mxu0 %v2830_v38  ;;  %v2861_v38 = vld [vmem:[#allocation9 + $0x338] sm:$0xff]  }
 0x7f1   :  { %2604 = vmatprep.subr.bf16.mxu0 %v3294_v44 }
 0x7f4   :  { %2605 = vmatpush3.bf16.msra.mxu0 %v2831_v39  ;;  %v2862_v39 = vld [vmem:[#allocation9 + $0x340] sm:$0xff]  }
 0x7f5   :  { %2606 = vmatprep.subr.bf16.mxu0 %v3294_v44 }
 0x7f8   :  { %2607 = vmatpush3.bf16.msra.mxu0 %v2832_v40  ;;  %v2863_v40 = vld [vmem:[#allocation9 + $0x348] sm:$0xff]  }
 0x7f9   :  { %2608 = vmatprep.subr.bf16.mxu0 %v3294_v44 }
 0x7fc   :  { %2609 = vmatpush3.bf16.msra.mxu0 %v2833_v41  ;;  %v2864_v41 = vld [vmem:[#allocation9 + $0x350] sm:$0xff]  }
 0x7fd   :  { %2610 = vmatprep.subr.bf16.mxu0 %v3294_v44 }
 0x800   :  { %2611 = vmatpush3.bf16.msra.mxu0 %v2834_v42  ;;  %v2865_v42 = vld [vmem:[#allocation9 + $0x358] sm:$0xff]  }
 0x801   :  { %2612 = vmatprep.subr.bf16.mxu0 %v3294_v44 }
 0x804   :  { %2613 = vmatpush3.bf16.msra.mxu0 %v2835_v43  ;;  %v2866_v43 = vld [vmem:[#allocation9 + $0x360] sm:$0xff]  }
 0x805   :  { %2614 = vmatprep.subr.bf16.mxu0 %v3294_v44 }
 0x808   :  { %2615 = vmatpush3.bf16.msra.mxu0 %v2836_v52 }
 0x809   :  { %2616 = vmatprep.subr.bf16.mxu0 %v3294_v44 }
 0x80c   :  { %2617 = vmatpush3.bf16.msra.mxu0 %v2837_v53  ;;  %v2868_v53 = vld [vmem:[#allocation9 + $0x370] sm:$0xff]  }
 0x80d   :  { %2642 = vmatprep.subr.bf16.mxu0 %v3294_v44 }
 0x8c2   :  { %v1155_v46 = vpop.f32.mrb[16].mxu0 }
 0x8c3   :  { %v1156_v0 = vadd.f32 %v1155_v46, %v1072_v45  ;;  %v2580_v47 = vpop.f32.mrb[17].mxu0  ;;  %v2867_v45 = vld [vmem:[#allocation9 + $0x368] sm:$0xff]   ;;  %v1504_v46 = vld [vmem:[#allocation12 + $0x14] ss:$0 sm:$0xff] }
 0x8c4   :  { %v1158_v48 = vpop.f32.mrb[18].mxu0 }
 0x8c5   :  { %v1161_v49 = vmax.f32 %v1156_v0, 0.0  ;;  %v2581_v50 = vpop.f32.mrb[19].mxu0 }
 0x8c7   :  { %v1162_v51 = vpack.c.bf16 %v1161_v49, %v1161_v49 }
 0x8c9   :  { %2599 = vmatmul.mubr.bf16.vlgmr.msra.gmra.mrb[16].mxu1 %v1162_v51 }
 0x8ca   :  { %2638 = vmatprep.mubr.msk.bf16.mxu1 %vm3110_vm0, %v3294_v44  ;;  %2623 = vmatpush3.bf16.msra.mxu1 %v2838_v54  ;;  %v2869_v54 = vld [vmem:[#allocation9 + $0x378] sm:$0xff]  }
 0x8cb   :  { %2624 = vmatprep.subr.bf16.mxu1 %v3294_v44 }
 0x8ce   :  { %2625 = vmatpush3.bf16.msra.mxu1 %v2839_v55  ;;  %v2870_v55 = vld [vmem:[#allocation9 + $0x380] sm:$0xff]  }
 0x8cf   :  { %2626 = vmatprep.subr.bf16.mxu1 %v3294_v44 }
 0x8d2   :  { %2627 = vmatpush3.bf16.msra.mxu1 %v2840_v56  ;;  %v2871_v56 = vld [vmem:[#allocation9 + $0x388] sm:$0xff]  }
 0x8d3   :  { %2628 = vmatprep.subr.bf16.mxu1 %v3294_v44 }
 0x8d6   :  { %2629 = vmatpush3.bf16.msra.mxu1 %v2841_v57  ;;  %v2872_v57 = vld [vmem:[#allocation9 + $0x390] sm:$0xff]  }
 0x8d7   :  { %2630 = vmatprep.subr.bf16.mxu1 %v3294_v44 }
 0x8da   :  { %2631 = vmatpush3.bf16.msra.mxu1 %v2842_v58  ;;  %v2873_v58 = vld [vmem:[#allocation9 + $0x398] sm:$0xff]  }
 0x8db   :  { %2632 = vmatprep.subr.bf16.mxu1 %v3294_v44 }
 0x8de   :  { %2633 = vmatpush3.bf16.msra.mxu1 %v2843_v59  ;;  %v2874_v59 = vld [vmem:[#allocation9 + $0x3a0] sm:$0xff]  }
 0x8df   :  { %2634 = vmatprep.subr.bf16.mxu1 %v3294_v44 }
 0x8e2   :  { %2635 = vmatpush3.bf16.msra.mxu1 %v2844_v5 }
 0x8e3   :  { %2636 = vmatprep.subr.bf16.mxu1 %v3294_v44 }
 0x8e6   :  { %2637 = vmatpush3.bf16.msra.mxu1 %v2845_v6  ;;  %v2876_v6 = vld [vmem:[#allocation9 + $0x3b0] sm:$0xff]  }
 0x8e7   :  { %2662 = vmatprep.subr.bf16.mxu1 %v3294_v44 }
 0x99c   :  { %v1263_v61 = vpop.f32.mrb[16].mxu1 }
 0x99d   :  { %v1264_v62 = vadd.f32 %v1263_v61, %v1180_v60  ;;  %v2600_v63 = vpop.f32.mrb[17].mxu1  ;;  %v2875_v60 = vld [vmem:[#allocation9 + $0x3a8] sm:$0xff]   ;;  %v1612_v61 = vld [vmem:[#allocation12 + $0x15] ss:$0 sm:$0xff] }
 0x99e   :  { %v1266_v1 = vpop.f32.mrb[18].mxu1 }
 0x99f   :  { %v1269_v2 = vmax.f32 %v1264_v62, 0.0  ;;  %v2601_v3 = vpop.f32.mrb[19].mxu1 }
 0x9a1   :  { %v1270_v4 = vpack.c.bf16 %v1269_v2, %v1269_v2 }
 0x9a3   :  { %2619 = vmatmul.mubr.bf16.vlgmr.msra.gmra.mrb[20].mxu0 %v1270_v4 }
 0x9a4   :  { %2658 = vmatprep.mubr.msk.bf16.mxu0 %vm3110_vm0, %v3294_v44  ;;  %2643 = vmatpush3.bf16.msra.mxu0 %v2846_v7  ;;  %v2877_v7 = vld [vmem:[#allocation9 + $0x3b8] sm:$0xff]  }
 0x9a5   :  { %2644 = vmatprep.subr.bf16.mxu0 %v3294_v44 }
 0x9a8   :  { %2645 = vmatpush3.bf16.msra.mxu0 %v2847_v8  ;;  %v2878_v8 = vld [vmem:[#allocation11] ss:$8 sps:$4 sm:$0xff]  }
 0x9a9   :  { %2646 = vmatprep.subr.bf16.mxu0 %v3294_v44 }
 0x9ac   :  { %2647 = vmatpush3.bf16.msra.mxu0 %v2848_v9  ;;  %v2880_v9 = vld [vmem:[#allocation11 + $0x4] ss:$8 sps:$4 sm:$0xff]  }
 0x9ad   :  { %2648 = vmatprep.subr.bf16.mxu0 %v3294_v44 }
 0x9b0   :  { %2649 = vmatpush3.bf16.msra.mxu0 %v2849_v10  ;;  %v2883_v10 = vld [vmem:[#allocation11 + $0x14] ss:$8 sps:$4 sm:$0xff]  }
 0x9b1   :  { %2650 = vmatprep.subr.bf16.mxu0 %v3294_v44 }
 0x9b4   :  { %2651 = vmatpush3.bf16.msra.mxu0 %v2850_v11  ;;  %v2881_v11 = vld [vmem:[#allocation11 + $0x10] ss:$8 sps:$4 sm:$0xff]  }
 0x9b5   :  { %2652 = vmatprep.subr.bf16.mxu0 %v3294_v44 }
 0x9b8   :  { %2653 = vmatpush3.bf16.msra.mxu0 %v2851_v12  ;;  %v2886_v12 = vld [vmem:[#allocation11 + $0x24] ss:$8 sps:$4 sm:$0xff]  }
 0x9b9   :  { %2654 = vmatprep.subr.bf16.mxu0 %v3294_v44 }
 0x9bc   :  { %2655 = vmatpush3.bf16.msra.mxu0 %v2852_v21  ;;  %v1720_v21 = vld [vmem:[#allocation12 + $0x16] ss:$0 sm:$0xff] }
 0x9bd   :  { %2656 = vmatprep.subr.bf16.mxu0 %v3294_v44 }
 0x9c0   :  { %2657 = vmatpush3.bf16.msra.mxu0 %v2853_v22 }
 0x9c1   :  { %2682 = vmatprep.subr.bf16.mxu0 %v3294_v44 }
 0xa76   :  { %v1371_v14 = vpop.f32.mrb[20].mxu0 }
 0xa77   :  { %v1372_v15 = vadd.f32 %v1371_v14, %v1288_v13  ;;  %v2620_v16 = vpop.f32.mrb[21].mxu0  ;;  %v2884_v13 = vld [vmem:[#allocation11 + $0x20] ss:$8 sps:$4 sm:$0xff]   ;;  %v2889_v14 = vld [vmem:[#allocation11 + $0x34] ss:$8 sps:$4 sm:$0xff]  }
 0xa78   :  { %v1374_v17 = vpop.f32.mrb[22].mxu0  ;;  %v2892_v16 = vld [vmem:[#allocation11 + $0x44] ss:$8 sps:$4 sm:$0xff]  }
 0xa79   :  { %v1377_v18 = vmax.f32 %v1372_v15, 0.0  ;;  %v2621_v19 = vpop.f32.mrb[23].mxu0  ;;  %v2887_v15 = vld [vmem:[#allocation11 + $0x30] ss:$8 sps:$4 sm:$0xff]   ;;  %v2895_v17 = vld [vmem:[#allocation11 + $0x54] ss:$8 sps:$4 sm:$0xff]  }
 0xa7a   :  { %v2898_v19 = vld [vmem:[#allocation11 + $0x64] ss:$8 sps:$4 sm:$0xff]  }
 0xa7b   :  { %v1378_v20 = vpack.c.bf16 %v1377_v18, %v1377_v18  ;;  %v2893_v18 = vld [vmem:[#allocation11 + $0x50] ss:$8 sps:$4 sm:$0xff]  }
 0xa7d   :  { %2639 = vmatmul.mubr.bf16.vlgmr.msra.gmra.mrb[20].mxu1 %v1378_v20  ;;  %v2896_v20 = vld [vmem:[#allocation11 + $0x60] ss:$8 sps:$4 sm:$0xff]  }
 0xa7e   :  { %2678 = vmatprep.mubr.msk.bf16.mxu1 %vm3110_vm0, %v3294_v44  ;;  %2663 = vmatpush3.bf16.msra.mxu1 %v2854_v23 }
 0xa7f   :  { %2664 = vmatprep.subr.bf16.mxu1 %v3294_v44 }
 0xa82   :  { %2665 = vmatpush3.bf16.msra.mxu1 %v2855_v24 }
 0xa83   :  { %2666 = vmatprep.subr.bf16.mxu1 %v3294_v44 }
 0xa86   :  { %2667 = vmatpush3.bf16.msra.mxu1 %v2856_v25 }
 0xa87   :  { %2668 = vmatprep.subr.bf16.mxu1 %v3294_v44 }
 0xa8a   :  { %2669 = vmatpush3.bf16.msra.mxu1 %v2857_v26 }
 0xa8b   :  { %2670 = vmatprep.subr.bf16.mxu1 %v3294_v44 }
 0xa8e   :  { %2671 = vmatpush3.bf16.msra.mxu1 %v2858_v27 }
 0xa8f   :  { %2672 = vmatprep.subr.bf16.mxu1 %v3294_v44 }
 0xa92   :  { %2673 = vmatpush3.bf16.msra.mxu1 %v2859_v28 }
 0xa93   :  { %2674 = vmatprep.subr.bf16.mxu1 %v3294_v44 }
 0xa96   :  { %2675 = vmatpush3.bf16.msra.mxu1 %v2860_v37 }
 0xa97   :  { %2676 = vmatprep.subr.bf16.mxu1 %v3294_v44 }
 0xa9a   :  { %2677 = vmatpush3.bf16.msra.mxu1 %v2861_v38 }
 0xa9b   :  { %2702 = vmatprep.subr.bf16.mxu1 %v3294_v44 }
 0xb50   :  { %v1479_v30 = vpop.f32.mrb[20].mxu1 }
 0xb51   :  { %v1480_v31 = vadd.f32 %v1479_v30, %v1396_v29  ;;  %v2640_v32 = vpop.f32.mrb[21].mxu1  ;;  %v2901_v29 = vld [vmem:[#allocation11 + $0x74] ss:$8 sps:$4 sm:$0xff]   ;;  %v2899_v30 = vld [vmem:[#allocation11 + $0x70] ss:$8 sps:$4 sm:$0xff]  }
 0xb52   :  { %v1482_v33 = vpop.f32.mrb[22].mxu1  ;;  %v1828_v32 = vld [vmem:[#allocation12 + $0x17] ss:$0 sm:$0xff] }
 0xb53   :  { %v1485_v34 = vmax.f32 %v1480_v31, 0.0  ;;  %v2641_v35 = vpop.f32.mrb[23].mxu1  ;;  %v3112_v31 = vmov 0  }
 0xb55   :  { %v1486_v36 = vpack.c.bf16 %v1485_v34, %v1485_v34 }
 0xb57   :  { %2659 = vmatmul.mubr.bf16.vlgmr.msra.gmra.mrb[24].mxu0 %v1486_v36 }
 0xb58   :  { %2698 = vmatprep.mubr.msk.bf16.mxu0 %vm3110_vm0, %v3294_v44  ;;  %2683 = vmatpush3.bf16.msra.mxu0 %v2862_v39 }
 0xb59   :  { %2684 = vmatprep.subr.bf16.mxu0 %v3294_v44 }
 0xb5c   :  { %2685 = vmatpush3.bf16.msra.mxu0 %v2863_v40 }
 0xb5d   :  { %2686 = vmatprep.subr.bf16.mxu0 %v3294_v44 }
 0xb60   :  { %2687 = vmatpush3.bf16.msra.mxu0 %v2864_v41 }
 0xb61   :  { %2688 = vmatprep.subr.bf16.mxu0 %v3294_v44 }
 0xb64   :  { %2689 = vmatpush3.bf16.msra.mxu0 %v2865_v42 }
 0xb65   :  { %2690 = vmatprep.subr.bf16.mxu0 %v3294_v44 }
 0xb68   :  { %2691 = vmatpush3.bf16.msra.mxu0 %v2866_v43 }
 0xb69   :  { %2692 = vmatprep.subr.bf16.mxu0 %v3294_v44 }
 0xb6c   :  { %2693 = vmatpush3.bf16.msra.mxu0 %v2867_v45 }
 0xb6d   :  { %2694 = vmatprep.subr.bf16.mxu0 %v3294_v44 }
 0xb70   :  { %2695 = vmatpush3.bf16.msra.mxu0 %v2868_v53 }
 0xb71   :  { %2696 = vmatprep.subr.bf16.mxu0 %v3294_v44 }
 0xb74   :  { %2697 = vmatpush3.bf16.msra.mxu0 %v2869_v54 }
 0xb75   :  { %2028 = vmatprep.subr.bf16.mxu0 %v2880_v9 }
 0xc2a   :  { %v1587_v0 = vpop.f32.mrb[24].mxu0 }
 0xc2b   :  { %v1588_v47 = vadd.f32 %v1587_v0, %v1504_v46  ;;  %v2660_v48 = vpop.f32.mrb[25].mxu0 }
 0xc2c   :  { %v1590_v49 = vpop.f32.mrb[26].mxu0 }
 0xc2d   :  { %v1593_v50 = vmax.f32 %v1588_v47, 0.0  ;;  %v2661_v51 = vpop.f32.mrb[27].mxu0 }
 0xc2f   :  { %v1594_v52 = vpack.c.bf16 %v1593_v50, %v1593_v50 }
 0xc31   :  { %2679 = vmatmul.mubr.bf16.vlgmr.msra.gmra.mrb[24].mxu1 %v1594_v52 }
 0xc32   :  { %2718 = vmatprep.mubr.msk.bf16.mxu1 %vm3110_vm0, %v3294_v44  ;;  %2703 = vmatpush3.bf16.msra.mxu1 %v2870_v55 }
 0xc33   :  { %2704 = vmatprep.subr.bf16.mxu1 %v3294_v44 }
 0xc36   :  { %2705 = vmatpush3.bf16.msra.mxu1 %v2871_v56 }
 0xc37   :  { %2706 = vmatprep.subr.bf16.mxu1 %v3294_v44 }
 0xc3a   :  { %2707 = vmatpush3.bf16.msra.mxu1 %v2872_v57 }
 0xc3b   :  { %2708 = vmatprep.subr.bf16.mxu1 %v3294_v44 }
 0xc3e   :  { %2709 = vmatpush3.bf16.msra.mxu1 %v2873_v58 }
 0xc3f   :  { %2710 = vmatprep.subr.bf16.mxu1 %v3294_v44 }
 0xc42   :  { %2711 = vmatpush3.bf16.msra.mxu1 %v2874_v59 }
 0xc43   :  { %2712 = vmatprep.subr.bf16.mxu1 %v3294_v44 }
 0xc46   :  { %2713 = vmatpush3.bf16.msra.mxu1 %v2875_v60 }
 0xc47   :  { %2714 = vmatprep.subr.bf16.mxu1 %v3294_v44 }
 0xc4a   :  { %2715 = vmatpush3.bf16.msra.mxu1 %v2876_v6 }
 0xc4b   :  { %2716 = vmatprep.subr.bf16.mxu1 %v3294_v44  ;;  %v2890_v44 = vld [vmem:[#allocation11 + $0x40] ss:$8 sps:$4 sm:$0xff]  }
 0xc4e   :  { %2717 = vmatpush3.bf16.msra.mxu1 %v2877_v7 }
 0xd04   :  { %v1695_v62 = vpop.f32.mrb[24].mxu1 }
 0xd05   :  { %v1696_v63 = vadd.f32 %v1695_v62, %v1612_v61  ;;  %v2680_v1 = vpop.f32.mrb[25].mxu1 }
 0xd06   :  { %v1698_v2 = vpop.f32.mrb[26].mxu1 }
 0xd07   :  { %v1701_v3 = vmax.f32 %v1696_v63, 0.0  ;;  %v2681_v4 = vpop.f32.mrb[27].mxu1 }
 0xd09   :  { %v1702_v5 = vpack.c.bf16 %v1701_v3, %v1701_v3 }
 0xd0b   :  { %2699 = vmatmul.mubr.bf16.vlgmr.msra.gmra.mrb[28].mxu0 %v1702_v5 }
 0xd0c   :  { %2029 = vmatpush1.bf16.msra.mxu0 %v2878_v8  ;;  %2060 = vmatprep.mubr.bf16.mxu0 %v3112_v31 }
 0xd0d   :  { %2030 = vmatprep.subr.bf16.mxu0 %v2883_v10 }
 0xd10   :  { %2031 = vmatpush1.bf16.msra.mxu0 %v2881_v11 }
 0xd11   :  { %2032 = vmatprep.subr.bf16.mxu0 %v2886_v12 }
 0xd14   :  { %2033 = vmatpush1.bf16.msra.mxu0 %v2884_v13 }
 0xd15   :  { %2034 = vmatprep.subr.bf16.mxu0 %v2889_v14 }
 0xd18   :  { %2035 = vmatpush1.bf16.msra.mxu0 %v2887_v15 }
 0xd19   :  { %2036 = vmatprep.subr.bf16.mxu0 %v2892_v16 }
 0xd1c   :  { %2037 = vmatpush1.bf16.msra.mxu0 %v2890_v44 }
 0xd1d   :  { %2038 = vmatprep.subr.bf16.mxu0 %v2895_v17 }
 0xd20   :  { %2039 = vmatpush1.bf16.msra.mxu0 %v2893_v18 }
 0xd21   :  { %2040 = vmatprep.subr.bf16.mxu0 %v2898_v19 }
 0xd24   :  { %2041 = vmatpush1.bf16.msra.mxu0 %v2896_v20 }
 0xd25   :  { %2042 = vmatprep.subr.bf16.mxu0 %v2901_v29 }
 0xd28   :  { %2043 = vmatpush1.bf16.msra.mxu0 %v2899_v30 }
 0xdde   :  { %v1803_v22 = vpop.f32.mrb[28].mxu0 }
 0xddf   :  { %v1804_v23 = vadd.f32 %v1803_v22, %v1720_v21  ;;  %v2700_v24 = vpop.f32.mrb[29].mxu0 }
 0xde0   :  { %v1806_v25 = vpop.f32.mrb[30].mxu0 }
 0xde1   :  { %v1809_v26 = vmax.f32 %v1804_v23, 0.0  ;;  %v2701_v27 = vpop.f32.mrb[31].mxu0 }
 0xde3   :  { %v1810_v28 = vpack.c.bf16 %v1809_v26, %v1809_v26 }
 0xde5   :  { %2719 = vmatmul.mubr.bf16.vlgmr.msra.gmra.mrb[28].mxu1 %v1810_v28 }
 0xeb8   :  { %v1911_v33 = vpop.f32.mrb[28].mxu1 }
 0xeb9   :  { %v1912_v34 = vadd.f32 %v1911_v33, %v1828_v32  ;;  %v2720_v35 = vpop.f32.mrb[29].mxu1 }
 0xeba   :  { %v1914_v36 = vpop.f32.mrb[30].mxu1 }
 0xebb   :  { %v1917_v37 = vmax.f32 %v1912_v34, 0.0  ;;  %v2721_v38 = vpop.f32.mrb[31].mxu1 }
 0xebd   :  { %v1918_v39 = vpack.c.bf16 %v1917_v37, %v1917_v37 }
 0xebf   :  { %2061 = vmatmul.mubr.bf16.vlgmr.msra.gmra.mrb[32].mxu0 %v1918_v39 }
 0xec0   :  { %3052 = shalt.err (!%p3049_p10)
}
 0xec1   :  { %s3053_s8 = scalar_lea.hbm %s3417_s7, 128 }
 0xec2   :  { %p3054_p11 = scmp.ne.s32.totalorder %s3417_s7, %s3053_s8  ;;  %p3057_p12 = scmp.lt.u32.totalorder %s3053_s8, %s3417_s7 }
 0xec4   :  { %p3059_p13 = pnand %p3057_p12, %p3054_p11 }
 0xec6   :  { %3062 = shalt.err (!%p3059_p13)
}
 0xec7   :  { %2098 = dma.vmem_to_hbm [thread:$0]  %s2096_s27, 128, %s3417_s7, [#allocation16]   ;;  %v1938_v40 = vlaneseq  ;;  %v1936_v43 = vld [vmem:[#allocation12 + $0x20] ss:$8 sm:$0x3] }
 0xec8   :  { %s3114_s7 = smov [#allocation14]  }
 0xec9   :  { %v1939_v41 = vshrl.u32 %v1938_v40, 7  ;;  %s2085_s25 = sshll.u32 %s3114_s7, 4  ;;  %s2086_s25 = int_to_ptr.vmem [resolvable:$true] %s2085_s25 }
 0xeca   :  { %s3063_s3 = scalar_lea.vmem %s2086_s25, 256  ;;  %p3068_p1 = scmp.lt.s32.totalorder %s2086_s25, %s2086_s25 }
 0xecb   :  { %v1940_v42 = vsub.s32 0, %v1939_v41  ;;  %v1944_v45 = vsub.s32 1, %v1939_v41  ;;  %p3064_p0 = scmp.ne.s32.totalorder %s2086_s25, %s3063_s3  ;;  %p3069_p2 = scmp.lt.s32.totalorder %s3063_s3, %s3063_s3 }
 0xecd   :  { %v1941_v46 = vrot.slane %v1936_v43, %v1940_v42  ;;  %v1945_v0 = vrot.slane %v1936_v43, %v1944_v45  ;;  %p3070_p3 = por %p3069_p2, %p3068_p1 }
 0xecf   :  { %p3071_p4 = pnand %p3070_p3, %p3064_p0 }
 0xf92   :  { %v2062_v47 = vpop.f32.mrb[32].mxu0 }
 0xf93   :  { %v2063_v48 = vadd.f32 %v2062_v47, %v1941_v46  ;;  %v2064_v49 = vpop.f32.mrb[33].mxu0 }
 0xf94   :  { %v2065_v50 = vadd.f32 %v2064_v49, %v1945_v0  ;;  %v2066_v51 = vpop.f32.mrb[34].mxu0 }
 0xf95   :  { %v2069_v52 = vmul.f32 0.5, %v2063_v48  ;;  %v2067_v53 = vpop.f32.mrb[35].mxu0 }
 0xf96   :  { %v2070_v54 = vmul.f32 0.5, %v2065_v50 }
 0xf97   :  { %2904 = vtanh.f32 %v2069_v52 }
 0xf98   :  { %2906 = vtanh.f32 %v2070_v54 }
 0xfa1   :  { %v2905_v55 = vpop.eup %2904 }
 0xfa2   :  { %v2907_v56 = vpop.eup %2906  ;;  %v2073_v57 = vadd.f32 1.0, %v2905_v55 }
 0xfa3   :  { %v2074_v58 = vadd.f32 1.0, %v2907_v56 }
 0xfa4   :  { %v2075_v59 = vmul.f32 0.5, %v2073_v57 }
 0xfa5   :  { %v2076_v60 = vmul.f32 0.5, %v2074_v58 }
 0xfa6   :  { %2077 = vst [vmem:[#allocation14] sm:$0xff] %v2075_v59 }
 0xfa7   :  { %2078 = vst [vmem:[#allocation14 + $0x8] sm:$0xff] %v2076_v60 }
 0xfa8   :  { %3074 = shalt.err (!%p3071_p4)
}
 0xfa9   :  { %s3075_s15 = scalar_lea.hbm %s3416_s6, 256 }
 0xfaa   :  { %p3076_p5 = scmp.ne.s32.totalorder %s3416_s6, %s3075_s15  ;;  %p3079_p6 = scmp.lt.u32.totalorder %s3075_s15, %s3416_s6 }
 0xfac   :  { %p3081_p7 = pnand %p3079_p6, %p3076_p5 }
 0xfae   :  { %3084 = shalt.err (!%p3081_p7)
}
 0xfaf   :  { %2088 = dma.vmem_to_hbm [thread:$0]  %s2086_s25, 256, %s3416_s6, [#allocation5]  }
 0xfb0   :  { %3093 = dma.done.wait [#allocation5], 256  }
 0xfb1   :  { %3094 = vsyncadd [#allocation5], 4294967040 }
 0xfb2   :  { %3095 = dma.done.wait [#allocation16], 128  }
 0xfb3   :  { %3096 = vsyncadd [#allocation16], 4294967168 }
 0xfb4   :  { %2105 = vsyncpa [#allocation4], 1 }
 0xfb5   :  { %2106 = vsyncpa [#allocation7], 1 }
 0xfb6   :  { %2107 = vsyncpa [#allocation10], 1 }
 0xfb7   :  { %2108 = vsyncpa [#allocation13], 1 }
 0xfb8   :  { %2109 = vsyncpa [#allocation5], 1 }
 0xfb9   :  { %2110 = vsyncpa [#allocation16], 1 }

</bundles_post_ra>
